<compile_context>
chip_gen: v5e
topology: v5e:2x2
jax: 0.10.0
libtpu: 0.0.40
codegen_flags: <defaults>
</compile_context>

<pallas_src>
import functools

import jax
import jax.numpy as jnp
from jax import lax
from jax.experimental import pallas as pl
from jax.experimental.pallas import tpu as pltpu


# Per-tile statistics block layout: (8, 128) f32.
#   sublane (row) = gradient-map index 0..5 in the order
#                   [R_right, G_right, B_right, R_down, G_down, B_down]
#                   (same order as torch.cat([R1, G1, B1, R2, G2, B2], 1)).
#   lane (column) = statistic index:
_COL_SUM_GX, _COL_SUM_GY = 0, 1
_COL_SUM_GX2, _COL_SUM_GY2 = 2, 3
_COL_SUM_GXGY = 4
_COL_MIN_GX, _COL_MIN_GY = 5, 6
_N_MAPS, _N_STATS = 6, 7
_STAT_ROWS, _STAT_LANES = 8, 128


def _make_stats_kernel(H, W, tile_h, ragged):
    """Per-(batch, H-tile) fused gradient-statistics kernel."""

    def kernel(x_ref, y_ref, halo_ref, o_ref):
        # x_ref, y_ref : (3, tile_h, W) native dtype -- one batch elem, one row tile.
        # halo_ref     : (6, W) native dtype -- rows 0..2: the x image row just
        #                below this tile (RGB), rows 3..5: same for y.  Pre-zeroed
        #                in the wrapper for the tile touching the image bottom.
        # o_ref        : (8, 128) f32 -- lane-dense per-tile statistics block.
        h = pl.program_id(1)
        row0 = h * tile_h

        row = lax.broadcasted_iota(jnp.int32, (tile_h, W), 0)
        col = lax.broadcasted_iota(jnp.int32, (tile_h, W), 1)
        has_right = col < (W - 1)
        # The single row whose "below" neighbour is NOT the next in-tile row: the
        # last in-image row of this tile (tile_h-1 except for a ragged last tile).
        seam = jnp.minimum(H - 1 - row0, tile_h - 1)
        is_seam = row == seam
        row_valid = (row + row0) < H if ragged else None

        flat = (lax.broadcasted_iota(jnp.int32, (_STAT_ROWS, _STAT_LANES), 0)
                * _STAT_LANES
                + lax.broadcasted_iota(jnp.int32, (_STAT_ROWS, _STAT_LANES), 1))
        blk = jnp.zeros((_STAT_ROWS, _STAT_LANES), jnp.float32)

        def stats7(gx, gy):
            # gx, gy: |gradient| maps of this tile, (tile_h, W) f32.
            if ragged:  # mask padded rows past the image bottom (last tile only)
                gxs = jnp.where(row_valid, gx, 0.0)
                gys = jnp.where(row_valid, gy, 0.0)
                gxm = jnp.where(row_valid, gx, jnp.inf)
                gym = jnp.where(row_valid, gy, jnp.inf)
            else:
                gxs, gys, gxm, gym = gx, gy, gx, gy
            return (jnp.sum(gxs, keepdims=True),
                    jnp.sum(gys, keepdims=True),
                    jnp.sum(gxs * gxs, keepdims=True),
                    jnp.sum(gys * gys, keepdims=True),
                    jnp.sum(gxs * gys, keepdims=True),
                    jnp.min(gxm, keepdims=True),
                    jnp.min(gym, keepdims=True))

        def place(blk, m, vals):
            # Scatter map m's 7 (1,1) stats into the single (8,128) block via
            # iota-selects: no scalar lane-concats, no masked partial stores, and
            # at most one extra vreg held across the channel loop.
            for s, v in enumerate(vals):
                blk = jnp.where(flat == (m * _STAT_LANES + s), v, blk)
            return blk

        for c in range(3):  # colour channels kept separate; maps never concatenated
            xc = x_ref[c].astype(jnp.float32)   # (tile_h, W), f32 accumulation
            yc = y_ref[c].astype(jnp.float32)

            # Right gradient: g[i, j] = |a[i, j] - a[i, j+1]|, |a| at the right edge
            # ('same' zero padding).  roll by W-1 (== -1) brings column j+1 to lane j.
            xn = jnp.where(has_right, pltpu.roll(xc, W - 1, 1), 0.0)
            yn = jnp.where(has_right, pltpu.roll(yc, W - 1, 1), 0.0)
            blk = place(blk, c, stats7(jnp.abs(xc - xn), jnp.abs(yc - yn)))

            # Down gradient: g[i, j] = |a[i, j] - a[i+1, j]|.  Single select: the
            # in-tile next row everywhere except the seam row, which takes the halo
            # row (next tile's first row, or zeros at the image bottom).
            xh = halo_ref[c:c + 1, :].astype(jnp.float32)        # (1, W)
            yh = halo_ref[3 + c:4 + c, :].astype(jnp.float32)
            xd = jnp.where(is_seam, xh, pltpu.roll(xc, tile_h - 1, 0))
            yd = jnp.where(is_seam, yh, pltpu.roll(yc, tile_h - 1, 0))
            blk = place(blk, 3 + c, stats7(jnp.abs(xc - xd), jnp.abs(yc - yd)))

        o_ref[...] = blk   # one dense (8,128) store; no init / masked row stores

    return kernel


def _vmem_capacity_bytes():
    """Physical per-core VMEM, with a conservative (v7x, 64 MiB) fallback."""
    try:
        return int(pltpu.get_tpu_info().vmem_capacity_bytes)
    except Exception:
        return 64 * 1024 * 1024


def _row_multiple(esize):
    # Sublane tile rule for the second-to-last block dim: 8 (f32), 16 (bf16/f16).
    return 8 if esize >= 4 else (16 if esize == 2 else 32)


def _tiling_plan(H, W, esize):
    """Pick tile_h and the scoped-VMEM limit from the chip's VMEM capacity."""
    vmem_cap = _vmem_capacity_bytes()
    # Keep headroom below physical VMEM: critical on v7x (64 MiB/TC), generous on
    # v5e/v6e (128 MiB) where this still unlocks multi-MiB input blocks.
    vmem_limit = max(32 << 20, min(int(vmem_cap * 0.8), vmem_cap - (12 << 20)))
    mult = _row_multiple(esize)
    # Per-grid-step budget: 2 inputs x 2 pipeline buffers x (3*tile_h*W*esize)
    # native-dtype blocks + ~16 f32 (tile_h, W) elementwise temporaries, plus a
    # fixed margin for halo / stats / iota blocks and Mosaic internal scratch.
    per_row = W * (12 * esize + 16 * 4)
    rows = (vmem_limit - (6 << 20)) // per_row
    rows = min(rows, max(mult, (1 << 20) // W))   # bound per-map unroll (~4 MiB f32)
    rows = max(mult, (rows // mult) * mult)
    tile_h = H if rows >= H else rows
    return tile_h, vmem_limit


def l_grad_cosist(x, y, *, block_h=None):
    """Forward pass of L_grad_cosist.  x, y: (B, 3, H, W) (NCHW)."""
    B, C, H, W = x.shape
    if C != 3 or y.shape != x.shape:
        raise ValueError(f"expected matching (B, 3, H, W) inputs, got {x.shape} / {y.shape}")
    # Keep the native dtype end-to-end (no full-size f32 copies in HBM); the
    # kernel casts each channel tile to f32 on load.
    if x.dtype not in (jnp.float32, jnp.bfloat16, jnp.float16):
        x = x.astype(jnp.float32)
    y = y.astype(x.dtype)
    esize = x.dtype.itemsize
    mult = _row_multiple(esize)

    auto_tile_h, vmem_limit = _tiling_plan(H, W, esize)
    if block_h is None:
        tile_h = auto_tile_h
    else:
        tile_h = min(int(block_h), H)
        if tile_h < H and tile_h % mult != 0:
            raise ValueError(f"block_h must be a multiple of {mult} when it tiles H")
    n_h = -(-H // tile_h)
    ragged = (H % tile_h) != 0

    # Packed halo: the 6 image rows (x RGB + y RGB) just below each tile, zeroed
    # for the tile touching the image bottom so the in-kernel seam select needs
    # no extra edge masking.  One tiny side input -> one extra DMA per grid step.
    below = jnp.arange(1, n_h + 1, dtype=jnp.int32) * tile_h            # (n_h,)
    in_img = below < H
    below_c = jnp.minimum(below, H - 1)
    halo = jnp.concatenate(
        [jnp.transpose(x[:, :, below_c, :], (0, 2, 1, 3)),
         jnp.transpose(y[:, :, below_c, :], (0, 2, 1, 3))], axis=2)      # (B, n_h, 6, W)
    halo = jnp.where(in_img[None, :, None, None], halo,
                     jnp.zeros((), dtype=halo.dtype))

    img_spec = pl.BlockSpec((None, 3, tile_h, W), lambda b, h: (b, 0, h, 0))
    halo_spec = pl.BlockSpec((None, None, 6, W), lambda b, h: (b, h, 0, 0))
    out_spec = pl.BlockSpec((None, None, _STAT_ROWS, _STAT_LANES),
                            lambda b, h: (b, h, 0, 0))

    # TODO(synk): on v7x (2 TensorCores) pick tile_h so B*n_h is even when B == 1,
    # and fold row blocks into the lane axis when W << 128 (lane utilisation).
    stats = pl.pallas_call(
        _make_stats_kernel(H, W, tile_h, ragged),
        out_shape=jax.ShapeDtypeStruct((B, n_h, _STAT_ROWS, _STAT_LANES), jnp.float32),
        grid_spec=pltpu.PrefetchScalarGridSpec(
            num_scalar_prefetch=0,
            grid=(B, n_h),
            in_specs=[img_spec, img_spec, halo_spec],
            out_specs=out_spec,
        ),
        compiler_params=pltpu.CompilerParams(
            dimension_semantics=("parallel", "parallel"),
            vmem_limit_bytes=int(vmem_limit),
        ),
    )(x, y, halo)

    # ----- tiny (B, 6) epilogue in plain JAX --------------------------------
    st = stats[:, :, :_N_MAPS, :_N_STATS]                     # (B, n_h, 6, 7)
    sum_gx = jnp.sum(st[..., _COL_SUM_GX], axis=1)            # (B, 6)
    sum_gy = jnp.sum(st[..., _COL_SUM_GY], axis=1)
    sum_gx2 = jnp.sum(st[..., _COL_SUM_GX2], axis=1)
    sum_gy2 = jnp.sum(st[..., _COL_SUM_GY2], axis=1)
    sum_gxgy = jnp.sum(st[..., _COL_SUM_GXGY], axis=1)
    mx = jnp.abs(jnp.min(st[..., _COL_MIN_GX], axis=1))
    my = jnp.abs(jnp.min(st[..., _COL_MIN_GY], axis=1))

    n = jnp.float32(H * W)
    # Centred moments via algebraic expansion of the "- |min|" shift:
    #   sum((gx-mx)(gy-my)) = S_xy - my*S_x - mx*S_y + N*mx*my, etc.
    prod = (sum_gxgy - my * sum_gx - mx * sum_gy + n * mx * my) / n
    xsq = jnp.maximum(sum_gx2 - 2.0 * mx * sum_gx + n * mx * mx, 0.0) / n
    ysq = jnp.maximum(sum_gy2 - 2.0 * my * sum_gy + n * my * my, 0.0) / n

    x_abs = jnp.sqrt(xsq)
    y_abs = jnp.sqrt(ysq)
    r = prod / (x_abs * y_abs + 1e-5)
    r = jnp.clip(r, -1.0, 1.0)          # guard arccos against f32 cancellation
    loss1 = jnp.mean(1.0 - r) + jnp.mean(jnp.arccos(r))

    prod_c = jnp.mean(prod, axis=1)
    x_abs2 = jnp.sqrt(jnp.mean(xsq, axis=1))
    y_abs2 = jnp.sqrt(jnp.mean(ysq, axis=1))
    r2 = prod_c / (x_abs2 * y_abs2 + 1e-5)
    r2 = jnp.clip(r2, -1.0, 1.0)
    loss2 = jnp.mean(1.0 - r2) + jnp.mean(jnp.arccos(r2))

    # NOTE: the PyTorch module also computes a four-quadrant patch loss but never
    # returns it (dead code) -> omitted.
    return loss1 + loss2


def _reference(x, y):
    """Pure-JAX replica of the PyTorch forward (for validation)."""
    x = x.astype(jnp.float32)
    y = y.astype(jnp.float32)

    def grads(a):
        right = jnp.abs(a - jnp.concatenate(
            [a[:, :, :, 1:], jnp.zeros_like(a[:, :, :, :1])], axis=3))
        down = jnp.abs(a - jnp.concatenate(
            [a[:, :, 1:, :], jnp.zeros_like(a[:, :, :1, :])], axis=2))
        return jnp.concatenate([right, down], axis=1)   # (B, 6, H, W)

    gx, gy = grads(x), grads(y)
    min_x = jnp.abs(jnp.min(gx, axis=(2, 3), keepdims=True))
    min_y = jnp.abs(jnp.min(gy, axis=(2, 3), keepdims=True))
    xc = gx - min_x
    yc = gy - min_y
    prod = jnp.mean(xc * yc, axis=(2, 3), keepdims=True)
    xa = jnp.mean(xc ** 2, axis=(2, 3), keepdims=True) ** 0.5
    ya = jnp.mean(yc ** 2, axis=(2, 3), keepdims=True) ** 0.5
    r = prod / (xa * ya + 1e-5)
    l1 = jnp.mean(1.0 - r) + jnp.mean(jnp.arccos(r))
    prod_c = jnp.mean(prod, axis=1, keepdims=True)
    xa2 = jnp.mean(xa ** 2, axis=1, keepdims=True) ** 0.5
    ya2 = jnp.mean(ya ** 2, axis=1, keepdims=True) ** 0.5
    r2 = prod_c / (xa2 * ya2 + 1e-5)
    l2 = jnp.mean(1.0 - r2) + jnp.mean(jnp.arccos(r2))
    return l1 + l2


if __name__ == "__main__":
    key = jax.random.PRNGKey(0)
    k1, k2, k3, k4 = jax.random.split(key, 4)

    # 1) Small image, single H tile, native f32.
    x1 = jax.random.uniform(k1, (2, 3, 16, 128), dtype=jnp.float32)
    y1 = jax.random.uniform(k2, (2, 3, 16, 128), dtype=jnp.float32)
    out1 = jax.block_until_ready(jax.jit(l_grad_cosist)(x1, y1))
    ref1 = jax.block_until_ready(_reference(x1, y1))
    assert jnp.isfinite(out1), out1
    assert jnp.allclose(out1, ref1, rtol=1e-3, atol=1e-3), (out1, ref1)

    # 2) Multi-tile + ragged H (exercises halo seam rows + bottom-tile masking).
    x2 = jax.random.uniform(k3, (2, 3, 40, 128), dtype=jnp.float32)
    y2 = jax.random.uniform(k4, (2, 3, 40, 128), dtype=jnp.float32)
    tiled = jax.jit(functools.partial(l_grad_cosist, block_h=16))
    out2 = jax.block_until_ready(tiled(x2, y2))
    ref2 = jax.block_until_ready(_reference(x2, y2))
    assert jnp.isfinite(out2), out2
    assert jnp.allclose(out2, ref2, rtol=1e-3, atol=1e-3), (out2, ref2)

    # 3) Native bf16 inputs (no wrapper upcast; kernel casts tiles to f32).
    x3 = x1.astype(jnp.bfloat16)
    y3 = y1.astype(jnp.bfloat16)
    out3 = jax.block_until_ready(jax.jit(l_grad_cosist)(x3, y3))
    ref3 = jax.block_until_ready(_reference(x3, y3))
    assert jnp.isfinite(out3), out3
    assert jnp.allclose(out3, ref3, rtol=1e-3, atol=1e-3), (out3, ref3)

    print("KERNEL_OK")
</pallas_src>

<mosaic_0001>
module attributes {stable_mosaic.version = 11 : i64} {
  func.func @kernel(%arg0: i32, %arg1: i32, %arg2: memref<1x3x16x128xf32, #tpu.memory_space<vmem>>, %arg3: memref<1x3x16x128xf32, #tpu.memory_space<vmem>>, %arg4: memref<1x1x6x128xf32, #tpu.memory_space<vmem>>, %arg5: memref<1x1x8x128xf32, #tpu.memory_space<vmem>>) attributes {dimension_semantics = [#tpu.dimension_semantics<parallel>, #tpu.dimension_semantics<parallel>], iteration_bounds = array<i64: 2, 1>, scalar_prefetch = 0 : i64, scratch_operands = 0 : i64, tpu.core_type = #tpu.core_type<tc>, window_params = [{transform_indices = @transform_0, window_bounds = array<i64: 1, 3, 16, 128>}, {transform_indices = @transform_1, window_bounds = array<i64: 1, 3, 16, 128>}, {transform_indices = @transform_2, window_bounds = array<i64: 1, 1, 6, 128>}, {transform_indices = @transform_3, window_bounds = array<i64: 1, 1, 8, 128>}]} {
    %c16_i32 = arith.constant 16 : i32
    %0 = arith.muli %arg1, %c16_i32 : i32
    %1 = tpu.iota {dimensions = array<i32: 0>} : vector<16x128xi32>
    %2 = tpu.iota {dimensions = array<i32: 1>} : vector<16x128xi32>
    %c127_i32 = arith.constant 127 : i32
    %3 = vector.broadcast %c127_i32 : i32 to vector<16x128xi32>
    %4 = arith.cmpi slt, %2, %3 : vector<16x128xi32>
    %c15_i32 = arith.constant 15 : i32
    %5 = arith.subi %c15_i32, %0 : i32
    %c15_i32_0 = arith.constant 15 : i32
    %6 = arith.minsi %5, %c15_i32_0 : i32
    %7 = vector.broadcast %6 : i32 to vector<16x128xi32>
    %8 = arith.cmpi eq, %1, %7 : vector<16x128xi32>
    %9 = tpu.iota {dimensions = array<i32: 0>} : vector<8x128xi32>
    %c128_i32 = arith.constant 128 : i32
    %10 = vector.broadcast %c128_i32 : i32 to vector<8x128xi32>
    %11 = arith.muli %9, %10 : vector<8x128xi32>
    %12 = tpu.iota {dimensions = array<i32: 1>} : vector<8x128xi32>
    %13 = arith.addi %11, %12 : vector<8x128xi32>
    %cst = arith.constant 0.000000e+00 : f32
    %14 = vector.broadcast %cst : f32 to vector<8x128xf32>
    %c0 = arith.constant 0 : index
    %c0_1 = arith.constant 0 : index
    %c0_2 = arith.constant 0 : index
    %c0_3 = arith.constant 0 : index
    %15 = vector.load %arg2[%c0, %c0_1, %c0_2, %c0_3] : memref<1x3x16x128xf32, #tpu.memory_space<vmem>>, vector<1x1x16x128xf32>
    %16 = vector.shape_cast %15 : vector<1x1x16x128xf32> to vector<16x128xf32>
    %c0_4 = arith.constant 0 : index
    %c0_5 = arith.constant 0 : index
    %c0_6 = arith.constant 0 : index
    %c0_7 = arith.constant 0 : index
    %17 = vector.load %arg3[%c0_4, %c0_5, %c0_6, %c0_7] : memref<1x3x16x128xf32, #tpu.memory_space<vmem>>, vector<1x1x16x128xf32>
    %18 = vector.shape_cast %17 : vector<1x1x16x128xf32> to vector<16x128xf32>
    %c127_i32_8 = arith.constant 127 : i32
    %19 = tpu.dynamic_rotate %16 by %c127_i32_8 dim 1 : vector<16x128xf32>, i32 -> vector<16x128xf32>
    %cst_9 = arith.constant 0.000000e+00 : f32
    %20 = vector.broadcast %cst_9 : f32 to vector<16x128xf32>
    %21 = arith.select %4, %19, %20 : vector<16x128xi1>, vector<16x128xf32>
    %c127_i32_10 = arith.constant 127 : i32
    %22 = tpu.dynamic_rotate %18 by %c127_i32_10 dim 1 : vector<16x128xf32>, i32 -> vector<16x128xf32>
    %cst_11 = arith.constant 0.000000e+00 : f32
    %23 = vector.broadcast %cst_11 : f32 to vector<16x128xf32>
    %24 = arith.select %4, %22, %23 : vector<16x128xi1>, vector<16x128xf32>
    %25 = arith.subf %16, %21 : vector<16x128xf32>
    %26 = math.absf %25 : vector<16x128xf32>
    %27 = arith.subf %18, %24 : vector<16x128xf32>
    %28 = math.absf %27 : vector<16x128xf32>
    %29 = vector.shape_cast %26 : vector<16x128xf32> to vector<1x16x128xf32>
    %cst_12 = arith.constant dense<0.000000e+00> : vector<1xf32>
    %30 = vector.multi_reduction <add>, %29, %cst_12 [1, 2] : vector<1x16x128xf32> to vector<1xf32>
    %31 = vector.shape_cast %30 : vector<1xf32> to vector<1x1x1xf32>
    %32 = vector.extract %31[0, 0, 0] : f32 from vector<1x1x1xf32>
    %33 = vector.broadcast %32 : f32 to vector<1x1xf32>
    %34 = vector.shape_cast %28 : vector<16x128xf32> to vector<1x16x128xf32>
    %cst_13 = arith.constant dense<0.000000e+00> : vector<1xf32>
    %35 = vector.multi_reduction <add>, %34, %cst_13 [1, 2] : vector<1x16x128xf32> to vector<1xf32>
    %36 = vector.shape_cast %35 : vector<1xf32> to vector<1x1x1xf32>
    %37 = vector.extract %36[0, 0, 0] : f32 from vector<1x1x1xf32>
    %38 = vector.broadcast %37 : f32 to vector<1x1xf32>
    %39 = arith.mulf %26, %26 : vector<16x128xf32>
    %40 = vector.shape_cast %39 : vector<16x128xf32> to vector<1x16x128xf32>
    %cst_14 = arith.constant dense<0.000000e+00> : vector<1xf32>
    %41 = vector.multi_reduction <add>, %40, %cst_14 [1, 2] : vector<1x16x128xf32> to vector<1xf32>
    %42 = vector.shape_cast %41 : vector<1xf32> to vector<1x1x1xf32>
    %43 = vector.extract %42[0, 0, 0] : f32 from vector<1x1x1xf32>
    %44 = vector.broadcast %43 : f32 to vector<1x1xf32>
    %45 = arith.mulf %28, %28 : vector<16x128xf32>
    %46 = vector.shape_cast %45 : vector<16x128xf32> to vector<1x16x128xf32>
    %cst_15 = arith.constant dense<0.000000e+00> : vector<1xf32>
    %47 = vector.multi_reduction <add>, %46, %cst_15 [1, 2] : vector<1x16x128xf32> to vector<1xf32>
    %48 = vector.shape_cast %47 : vector<1xf32> to vector<1x1x1xf32>
    %49 = vector.extract %48[0, 0, 0] : f32 from vector<1x1x1xf32>
    %50 = vector.broadcast %49 : f32 to vector<1x1xf32>
    %51 = arith.mulf %26, %28 : vector<16x128xf32>
    %52 = vector.shape_cast %51 : vector<16x128xf32> to vector<1x16x128xf32>
    %cst_16 = arith.constant dense<0.000000e+00> : vector<1xf32>
    %53 = vector.multi_reduction <add>, %52, %cst_16 [1, 2] : vector<1x16x128xf32> to vector<1xf32>
    %54 = vector.shape_cast %53 : vector<1xf32> to vector<1x1x1xf32>
    %55 = vector.extract %54[0, 0, 0] : f32 from vector<1x1x1xf32>
    %56 = vector.broadcast %55 : f32 to vector<1x1xf32>
    %57 = vector.shape_cast %26 : vector<16x128xf32> to vector<1x16x128xf32>
    %cst_17 = arith.constant dense<0x7F800000> : vector<1xf32>
    %58 = vector.multi_reduction <minimumf>, %57, %cst_17 [1, 2] : vector<1x16x128xf32> to vector<1xf32>
    %59 = vector.shape_cast %58 : vector<1xf32> to vector<1x1x1xf32>
    %60 = vector.extract %59[0, 0, 0] : f32 from vector<1x1x1xf32>
    %61 = vector.broadcast %60 : f32 to vector<1x1xf32>
    %62 = vector.shape_cast %28 : vector<16x128xf32> to vector<1x16x128xf32>
    %cst_18 = arith.constant dense<0x7F800000> : vector<1xf32>
    %63 = vector.multi_reduction <minimumf>, %62, %cst_18 [1, 2] : vector<1x16x128xf32> to vector<1xf32>
    %64 = vector.shape_cast %63 : vector<1xf32> to vector<1x1x1xf32>
    %65 = vector.extract %64[0, 0, 0] : f32 from vector<1x1x1xf32>
    %66 = vector.broadcast %65 : f32 to vector<1x1xf32>
    %c0_i32 = arith.constant 0 : i32
    %67 = vector.broadcast %c0_i32 : i32 to vector<8x128xi32>
    %68 = arith.cmpi eq, %13, %67 : vector<8x128xi32>
    %69 = vector.shape_cast %33 : vector<1x1xf32> to vector<1x1xf32>
    %70 = vector.broadcast %69 : vector<1x1xf32> to vector<8x128xf32>
    %71 = arith.select %68, %70, %14 : vector<8x128xi1>, vector<8x128xf32>
    %c1_i32 = arith.constant 1 : i32
    %72 = vector.broadcast %c1_i32 : i32 to vector<8x128xi32>
    %73 = arith.cmpi eq, %13, %72 : vector<8x128xi32>
    %74 = vector.shape_cast %38 : vector<1x1xf32> to vector<1x1xf32>
    %75 = vector.broadcast %74 : vector<1x1xf32> to vector<8x128xf32>
    %76 = arith.select %73, %75, %71 : vector<8x128xi1>, vector<8x128xf32>
    %c2_i32 = arith.constant 2 : i32
    %77 = vector.broadcast %c2_i32 : i32 to vector<8x128xi32>
    %78 = arith.cmpi eq, %13, %77 : vector<8x128xi32>
    %79 = vector.shape_cast %44 : vector<1x1xf32> to vector<1x1xf32>
    %80 = vector.broadcast %79 : vector<1x1xf32> to vector<8x128xf32>
    %81 = arith.select %78, %80, %76 : vector<8x128xi1>, vector<8x128xf32>
    %c3_i32 = arith.constant 3 : i32
    %82 = vector.broadcast %c3_i32 : i32 to vector<8x128xi32>
    %83 = arith.cmpi eq, %13, %82 : vector<8x128xi32>
    %84 = vector.shape_cast %50 : vector<1x1xf32> to vector<1x1xf32>
    %85 = vector.broadcast %84 : vector<1x1xf32> to vector<8x128xf32>
    %86 = arith.select %83, %85, %81 : vector<8x128xi1>, vector<8x128xf32>
    %c4_i32 = arith.constant 4 : i32
    %87 = vector.broadcast %c4_i32 : i32 to vector<8x128xi32>
    %88 = arith.cmpi eq, %13, %87 : vector<8x128xi32>
    %89 = vector.shape_cast %56 : vector<1x1xf32> to vector<1x1xf32>
    %90 = vector.broadcast %89 : vector<1x1xf32> to vector<8x128xf32>
    %91 = arith.select %88, %90, %86 : vector<8x128xi1>, vector<8x128xf32>
    %c5_i32 = arith.constant 5 : i32
    %92 = vector.broadcast %c5_i32 : i32 to vector<8x128xi32>
    %93 = arith.cmpi eq, %13, %92 : vector<8x128xi32>
    %94 = vector.shape_cast %61 : vector<1x1xf32> to vector<1x1xf32>
    %95 = vector.broadcast %94 : vector<1x1xf32> to vector<8x128xf32>
    %96 = arith.select %93, %95, %91 : vector<8x128xi1>, vector<8x128xf32>
    %c6_i32 = arith.constant 6 : i32
    %97 = vector.broadcast %c6_i32 : i32 to vector<8x128xi32>
    %98 = arith.cmpi eq, %13, %97 : vector<8x128xi32>
    %99 = vector.shape_cast %66 : vector<1x1xf32> to vector<1x1xf32>
    %100 = vector.broadcast %99 : vector<1x1xf32> to vector<8x128xf32>
    %101 = arith.select %98, %100, %96 : vector<8x128xi1>, vector<8x128xf32>
    %c0_19 = arith.constant 0 : index
    %c0_20 = arith.constant 0 : index
    %c0_21 = arith.constant 0 : index
    %c0_22 = arith.constant 0 : index
    %102 = vector.load %arg4[%c0_19, %c0_20, %c0_21, %c0_22] : memref<1x1x6x128xf32, #tpu.memory_space<vmem>>, vector<1x1x1x128xf32>
    %103 = vector.shape_cast %102 : vector<1x1x1x128xf32> to vector<1x128xf32>
    %c0_23 = arith.constant 0 : index
    %c0_24 = arith.constant 0 : index
    %c3 = arith.constant 3 : index
    %c0_25 = arith.constant 0 : index
    %104 = vector.load %arg4[%c0_23, %c0_24, %c3, %c0_25] : memref<1x1x6x128xf32, #tpu.memory_space<vmem>>, vector<1x1x1x128xf32>
    %105 = vector.shape_cast %104 : vector<1x1x1x128xf32> to vector<1x128xf32>
    %c15_i32_26 = arith.constant 15 : i32
    %106 = tpu.dynamic_rotate %16 by %c15_i32_26 dim 0 : vector<16x128xf32>, i32 -> vector<16x128xf32>
    %107 = vector.shape_cast %103 : vector<1x128xf32> to vector<1x128xf32>
    %108 = vector.broadcast %107 : vector<1x128xf32> to vector<16x128xf32>
    %109 = arith.select %8, %108, %106 : vector<16x128xi1>, vector<16x128xf32>
    %c15_i32_27 = arith.constant 15 : i32
    %110 = tpu.dynamic_rotate %18 by %c15_i32_27 dim 0 : vector<16x128xf32>, i32 -> vector<16x128xf32>
    %111 = vector.shape_cast %105 : vector<1x128xf32> to vector<1x128xf32>
    %112 = vector.broadcast %111 : vector<1x128xf32> to vector<16x128xf32>
    %113 = arith.select %8, %112, %110 : vector<16x128xi1>, vector<16x128xf32>
    %114 = arith.subf %16, %109 : vector<16x128xf32>
    %115 = math.absf %114 : vector<16x128xf32>
    %116 = arith.subf %18, %113 : vector<16x128xf32>
    %117 = math.absf %116 : vector<16x128xf32>
    %118 = vector.shape_cast %115 : vector<16x128xf32> to vector<1x16x128xf32>
    %cst_28 = arith.constant dense<0.000000e+00> : vector<1xf32>
    %119 = vector.multi_reduction <add>, %118, %cst_28 [1, 2] : vector<1x16x128xf32> to vector<1xf32>
    %120 = vector.shape_cast %119 : vector<1xf32> to vector<1x1x1xf32>
    %121 = vector.extract %120[0, 0, 0] : f32 from vector<1x1x1xf32>
    %122 = vector.broadcast %121 : f32 to vector<1x1xf32>
    %123 = vector.shape_cast %117 : vector<16x128xf32> to vector<1x16x128xf32>
    %cst_29 = arith.constant dense<0.000000e+00> : vector<1xf32>
    %124 = vector.multi_reduction <add>, %123, %cst_29 [1, 2] : vector<1x16x128xf32> to vector<1xf32>
    %125 = vector.shape_cast %124 : vector<1xf32> to vector<1x1x1xf32>
    %126 = vector.extract %125[0, 0, 0] : f32 from vector<1x1x1xf32>
    %127 = vector.broadcast %126 : f32 to vector<1x1xf32>
    %128 = arith.mulf %115, %115 : vector<16x128xf32>
    %129 = vector.shape_cast %128 : vector<16x128xf32> to vector<1x16x128xf32>
    %cst_30 = arith.constant dense<0.000000e+00> : vector<1xf32>
    %130 = vector.multi_reduction <add>, %129, %cst_30 [1, 2] : vector<1x16x128xf32> to vector<1xf32>
    %131 = vector.shape_cast %130 : vector<1xf32> to vector<1x1x1xf32>
    %132 = vector.extract %131[0, 0, 0] : f32 from vector<1x1x1xf32>
    %133 = vector.broadcast %132 : f32 to vector<1x1xf32>
    %134 = arith.mulf %117, %117 : vector<16x128xf32>
    %135 = vector.shape_cast %134 : vector<16x128xf32> to vector<1x16x128xf32>
    %cst_31 = arith.constant dense<0.000000e+00> : vector<1xf32>
    %136 = vector.multi_reduction <add>, %135, %cst_31 [1, 2] : vector<1x16x128xf32> to vector<1xf32>
    %137 = vector.shape_cast %136 : vector<1xf32> to vector<1x1x1xf32>
    %138 = vector.extract %137[0, 0, 0] : f32 from vector<1x1x1xf32>
    %139 = vector.broadcast %138 : f32 to vector<1x1xf32>
    %140 = arith.mulf %115, %117 : vector<16x128xf32>
    %141 = vector.shape_cast %140 : vector<16x128xf32> to vector<1x16x128xf32>
    %cst_32 = arith.constant dense<0.000000e+00> : vector<1xf32>
    %142 = vector.multi_reduction <add>, %141, %cst_32 [1, 2] : vector<1x16x128xf32> to vector<1xf32>
    %143 = vector.shape_cast %142 : vector<1xf32> to vector<1x1x1xf32>
    %144 = vector.extract %143[0, 0, 0] : f32 from vector<1x1x1xf32>
    %145 = vector.broadcast %144 : f32 to vector<1x1xf32>
    %146 = vector.shape_cast %115 : vector<16x128xf32> to vector<1x16x128xf32>
    %cst_33 = arith.constant dense<0x7F800000> : vector<1xf32>
    %147 = vector.multi_reduction <minimumf>, %146, %cst_33 [1, 2] : vector<1x16x128xf32> to vector<1xf32>
    %148 = vector.shape_cast %147 : vector<1xf32> to vector<1x1x1xf32>
    %149 = vector.extract %148[0, 0, 0] : f32 from vector<1x1x1xf32>
    %150 = vector.broadcast %149 : f32 to vector<1x1xf32>
    %151 = vector.shape_cast %117 : vector<16x128xf32> to vector<1x16x128xf32>
    %cst_34 = arith.constant dense<0x7F800000> : vector<1xf32>
    %152 = vector.multi_reduction <minimumf>, %151, %cst_34 [1, 2] : vector<1x16x128xf32> to vector<1xf32>
    %153 = vector.shape_cast %152 : vector<1xf32> to vector<1x1x1xf32>
    %154 = vector.extract %153[0, 0, 0] : f32 from vector<1x1x1xf32>
    %155 = vector.broadcast %154 : f32 to vector<1x1xf32>
    %c384_i32 = arith.constant 384 : i32
    %156 = vector.broadcast %c384_i32 : i32 to vector<8x128xi32>
    %157 = arith.cmpi eq, %13, %156 : vector<8x128xi32>
    %158 = vector.shape_cast %122 : vector<1x1xf32> to vector<1x1xf32>
    %159 = vector.broadcast %158 : vector<1x1xf32> to vector<8x128xf32>
    %160 = arith.select %157, %159, %101 : vector<8x128xi1>, vector<8x128xf32>
    %c385_i32 = arith.constant 385 : i32
    %161 = vector.broadcast %c385_i32 : i32 to vector<8x128xi32>
    %162 = arith.cmpi eq, %13, %161 : vector<8x128xi32>
    %163 = vector.shape_cast %127 : vector<1x1xf32> to vector<1x1xf32>
    %164 = vector.broadcast %163 : vector<1x1xf32> to vector<8x128xf32>
    %165 = arith.select %162, %164, %160 : vector<8x128xi1>, vector<8x128xf32>
    %c386_i32 = arith.constant 386 : i32
    %166 = vector.broadcast %c386_i32 : i32 to vector<8x128xi32>
    %167 = arith.cmpi eq, %13, %166 : vector<8x128xi32>
    %168 = vector.shape_cast %133 : vector<1x1xf32> to vector<1x1xf32>
    %169 = vector.broadcast %168 : vector<1x1xf32> to vector<8x128xf32>
    %170 = arith.select %167, %169, %165 : vector<8x128xi1>, vector<8x128xf32>
    %c387_i32 = arith.constant 387 : i32
    %171 = vector.broadcast %c387_i32 : i32 to vector<8x128xi32>
    %172 = arith.cmpi eq, %13, %171 : vector<8x128xi32>
    %173 = vector.shape_cast %139 : vector<1x1xf32> to vector<1x1xf32>
    %174 = vector.broadcast %173 : vector<1x1xf32> to vector<8x128xf32>
    %175 = arith.select %172, %174, %170 : vector<8x128xi1>, vector<8x128xf32>
    %c388_i32 = arith.constant 388 : i32
    %176 = vector.broadcast %c388_i32 : i32 to vector<8x128xi32>
    %177 = arith.cmpi eq, %13, %176 : vector<8x128xi32>
    %178 = vector.shape_cast %145 : vector<1x1xf32> to vector<1x1xf32>
    %179 = vector.broadcast %178 : vector<1x1xf32> to vector<8x128xf32>
    %180 = arith.select %177, %179, %175 : vector<8x128xi1>, vector<8x128xf32>
    %c389_i32 = arith.constant 389 : i32
    %181 = vector.broadcast %c389_i32 : i32 to vector<8x128xi32>
    %182 = arith.cmpi eq, %13, %181 : vector<8x128xi32>
    %183 = vector.shape_cast %150 : vector<1x1xf32> to vector<1x1xf32>
    %184 = vector.broadcast %183 : vector<1x1xf32> to vector<8x128xf32>
    %185 = arith.select %182, %184, %180 : vector<8x128xi1>, vector<8x128xf32>
    %c390_i32 = arith.constant 390 : i32
    %186 = vector.broadcast %c390_i32 : i32 to vector<8x128xi32>
    %187 = arith.cmpi eq, %13, %186 : vector<8x128xi32>
    %188 = vector.shape_cast %155 : vector<1x1xf32> to vector<1x1xf32>
    %189 = vector.broadcast %188 : vector<1x1xf32> to vector<8x128xf32>
    %190 = arith.select %187, %189, %185 : vector<8x128xi1>, vector<8x128xf32>
    %c0_35 = arith.constant 0 : index
    %c1 = arith.constant 1 : index
    %c0_36 = arith.constant 0 : index
    %c0_37 = arith.constant 0 : index
    %191 = vector.load %arg2[%c0_35, %c1, %c0_36, %c0_37] : memref<1x3x16x128xf32, #tpu.memory_space<vmem>>, vector<1x1x16x128xf32>
    %192 = vector.shape_cast %191 : vector<1x1x16x128xf32> to vector<16x128xf32>
    %c0_38 = arith.constant 0 : index
    %c1_39 = arith.constant 1 : index
    %c0_40 = arith.constant 0 : index
    %c0_41 = arith.constant 0 : index
    %193 = vector.load %arg3[%c0_38, %c1_39, %c0_40, %c0_41] : memref<1x3x16x128xf32, #tpu.memory_space<vmem>>, vector<1x1x16x128xf32>
    %194 = vector.shape_cast %193 : vector<1x1x16x128xf32> to vector<16x128xf32>
    %c127_i32_42 = arith.constant 127 : i32
    %195 = tpu.dynamic_rotate %192 by %c127_i32_42 dim 1 : vector<16x128xf32>, i32 -> vector<16x128xf32>
    %cst_43 = arith.constant 0.000000e+00 : f32
    %196 = vector.broadcast %cst_43 : f32 to vector<16x128xf32>
    %197 = arith.select %4, %195, %196 : vector<16x128xi1>, vector<16x128xf32>
    %c127_i32_44 = arith.constant 127 : i32
    %198 = tpu.dynamic_rotate %194 by %c127_i32_44 dim 1 : vector<16x128xf32>, i32 -> vector<16x128xf32>
    %cst_45 = arith.constant 0.000000e+00 : f32
    %199 = vector.broadcast %cst_45 : f32 to vector<16x128xf32>
    %200 = arith.select %4, %198, %199 : vector<16x128xi1>, vector<16x128xf32>
    %201 = arith.subf %192, %197 : vector<16x128xf32>
    %202 = math.absf %201 : vector<16x128xf32>
    %203 = arith.subf %194, %200 : vector<16x128xf32>
    %204 = math.absf %203 : vector<16x128xf32>
    %205 = vector.shape_cast %202 : vector<16x128xf32> to vector<1x16x128xf32>
    %cst_46 = arith.constant dense<0.000000e+00> : vector<1xf32>
    %206 = vector.multi_reduction <add>, %205, %cst_46 [1, 2] : vector<1x16x128xf32> to vector<1xf32>
    %207 = vector.shape_cast %206 : vector<1xf32> to vector<1x1x1xf32>
    %208 = vector.extract %207[0, 0, 0] : f32 from vector<1x1x1xf32>
    %209 = vector.broadcast %208 : f32 to vector<1x1xf32>
    %210 = vector.shape_cast %204 : vector<16x128xf32> to vector<1x16x128xf32>
    %cst_47 = arith.constant dense<0.000000e+00> : vector<1xf32>
    %211 = vector.multi_reduction <add>, %210, %cst_47 [1, 2] : vector<1x16x128xf32> to vector<1xf32>
    %212 = vector.shape_cast %211 : vector<1xf32> to vector<1x1x1xf32>
    %213 = vector.extract %212[0, 0, 0] : f32 from vector<1x1x1xf32>
    %214 = vector.broadcast %213 : f32 to vector<1x1xf32>
    %215 = arith.mulf %202, %202 : vector<16x128xf32>
    %216 = vector.shape_cast %215 : vector<16x128xf32> to vector<1x16x128xf32>
    %cst_48 = arith.constant dense<0.000000e+00> : vector<1xf32>
    %217 = vector.multi_reduction <add>, %216, %cst_48 [1, 2] : vector<1x16x128xf32> to vector<1xf32>
    %218 = vector.shape_cast %217 : vector<1xf32> to vector<1x1x1xf32>
    %219 = vector.extract %218[0, 0, 0] : f32 from vector<1x1x1xf32>
    %220 = vector.broadcast %219 : f32 to vector<1x1xf32>
    %221 = arith.mulf %204, %204 : vector<16x128xf32>
    %222 = vector.shape_cast %221 : vector<16x128xf32> to vector<1x16x128xf32>
    %cst_49 = arith.constant dense<0.000000e+00> : vector<1xf32>
    %223 = vector.multi_reduction <add>, %222, %cst_49 [1, 2] : vector<1x16x128xf32> to vector<1xf32>
    %224 = vector.shape_cast %223 : vector<1xf32> to vector<1x1x1xf32>
    %225 = vector.extract %224[0, 0, 0] : f32 from vector<1x1x1xf32>
    %226 = vector.broadcast %225 : f32 to vector<1x1xf32>
    %227 = arith.mulf %202, %204 : vector<16x128xf32>
    %228 = vector.shape_cast %227 : vector<16x128xf32> to vector<1x16x128xf32>
    %cst_50 = arith.constant dense<0.000000e+00> : vector<1xf32>
    %229 = vector.multi_reduction <add>, %228, %cst_50 [1, 2] : vector<1x16x128xf32> to vector<1xf32>
    %230 = vector.shape_cast %229 : vector<1xf32> to vector<1x1x1xf32>
    %231 = vector.extract %230[0, 0, 0] : f32 from vector<1x1x1xf32>
    %232 = vector.broadcast %231 : f32 to vector<1x1xf32>
    %233 = vector.shape_cast %202 : vector<16x128xf32> to vector<1x16x128xf32>
    %cst_51 = arith.constant dense<0x7F800000> : vector<1xf32>
    %234 = vector.multi_reduction <minimumf>, %233, %cst_51 [1, 2] : vector<1x16x128xf32> to vector<1xf32>
    %235 = vector.shape_cast %234 : vector<1xf32> to vector<1x1x1xf32>
    %236 = vector.extract %235[0, 0, 0] : f32 from vector<1x1x1xf32>
    %237 = vector.broadcast %236 : f32 to vector<1x1xf32>
    %238 = vector.shape_cast %204 : vector<16x128xf32> to vector<1x16x128xf32>
    %cst_52 = arith.constant dense<0x7F800000> : vector<1xf32>
    %239 = vector.multi_reduction <minimumf>, %238, %cst_52 [1, 2] : vector<1x16x128xf32> to vector<1xf32>
    %240 = vector.shape_cast %239 : vector<1xf32> to vector<1x1x1xf32>
    %241 = vector.extract %240[0, 0, 0] : f32 from vector<1x1x1xf32>
    %242 = vector.broadcast %241 : f32 to vector<1x1xf32>
    %c128_i32_53 = arith.constant 128 : i32
    %243 = vector.broadcast %c128_i32_53 : i32 to vector<8x128xi32>
    %244 = arith.cmpi eq, %13, %243 : vector<8x128xi32>
    %245 = vector.shape_cast %209 : vector<1x1xf32> to vector<1x1xf32>
    %246 = vector.broadcast %245 : vector<1x1xf32> to vector<8x128xf32>
    %247 = arith.select %244, %246, %190 : vector<8x128xi1>, vector<8x128xf32>
    %c129_i32 = arith.constant 129 : i32
    %248 = vector.broadcast %c129_i32 : i32 to vector<8x128xi32>
    %249 = arith.cmpi eq, %13, %248 : vector<8x128xi32>
    %250 = vector.shape_cast %214 : vector<1x1xf32> to vector<1x1xf32>
    %251 = vector.broadcast %250 : vector<1x1xf32> to vector<8x128xf32>
    %252 = arith.select %249, %251, %247 : vector<8x128xi1>, vector<8x128xf32>
    %c130_i32 = arith.constant 130 : i32
    %253 = vector.broadcast %c130_i32 : i32 to vector<8x128xi32>
    %254 = arith.cmpi eq, %13, %253 : vector<8x128xi32>
    %255 = vector.shape_cast %220 : vector<1x1xf32> to vector<1x1xf32>
    %256 = vector.broadcast %255 : vector<1x1xf32> to vector<8x128xf32>
    %257 = arith.select %254, %256, %252 : vector<8x128xi1>, vector<8x128xf32>
    %c131_i32 = arith.constant 131 : i32
    %258 = vector.broadcast %c131_i32 : i32 to vector<8x128xi32>
    %259 = arith.cmpi eq, %13, %258 : vector<8x128xi32>
    %260 = vector.shape_cast %226 : vector<1x1xf32> to vector<1x1xf32>
    %261 = vector.broadcast %260 : vector<1x1xf32> to vector<8x128xf32>
    %262 = arith.select %259, %261, %257 : vector<8x128xi1>, vector<8x128xf32>
    %c132_i32 = arith.constant 132 : i32
    %263 = vector.broadcast %c132_i32 : i32 to vector<8x128xi32>
    %264 = arith.cmpi eq, %13, %263 : vector<8x128xi32>
    %265 = vector.shape_cast %232 : vector<1x1xf32> to vector<1x1xf32>
    %266 = vector.broadcast %265 : vector<1x1xf32> to vector<8x128xf32>
    %267 = arith.select %264, %266, %262 : vector<8x128xi1>, vector<8x128xf32>
    %c133_i32 = arith.constant 133 : i32
    %268 = vector.broadcast %c133_i32 : i32 to vector<8x128xi32>
    %269 = arith.cmpi eq, %13, %268 : vector<8x128xi32>
    %270 = vector.shape_cast %237 : vector<1x1xf32> to vector<1x1xf32>
    %271 = vector.broadcast %270 : vector<1x1xf32> to vector<8x128xf32>
    %272 = arith.select %269, %271, %267 : vector<8x128xi1>, vector<8x128xf32>
    %c134_i32 = arith.constant 134 : i32
    %273 = vector.broadcast %c134_i32 : i32 to vector<8x128xi32>
    %274 = arith.cmpi eq, %13, %273 : vector<8x128xi32>
    %275 = vector.shape_cast %242 : vector<1x1xf32> to vector<1x1xf32>
    %276 = vector.broadcast %275 : vector<1x1xf32> to vector<8x128xf32>
    %277 = arith.select %274, %276, %272 : vector<8x128xi1>, vector<8x128xf32>
    %c0_54 = arith.constant 0 : index
    %c0_55 = arith.constant 0 : index
    %c1_56 = arith.constant 1 : index
    %c0_57 = arith.constant 0 : index
    %278 = vector.load %arg4[%c0_54, %c0_55, %c1_56, %c0_57] : memref<1x1x6x128xf32, #tpu.memory_space<vmem>>, vector<1x1x1x128xf32>
    %279 = vector.shape_cast %278 : vector<1x1x1x128xf32> to vector<1x128xf32>
    %c0_58 = arith.constant 0 : index
    %c0_59 = arith.constant 0 : index
    %c4 = arith.constant 4 : index
    %c0_60 = arith.constant 0 : index
    %280 = vector.load %arg4[%c0_58, %c0_59, %c4, %c0_60] : memref<1x1x6x128xf32, #tpu.memory_space<vmem>>, vector<1x1x1x128xf32>
    %281 = vector.shape_cast %280 : vector<1x1x1x128xf32> to vector<1x128xf32>
    %c15_i32_61 = arith.constant 15 : i32
    %282 = tpu.dynamic_rotate %192 by %c15_i32_61 dim 0 : vector<16x128xf32>, i32 -> vector<16x128xf32>
    %283 = vector.shape_cast %279 : vector<1x128xf32> to vector<1x128xf32>
    %284 = vector.broadcast %283 : vector<1x128xf32> to vector<16x128xf32>
    %285 = arith.select %8, %284, %282 : vector<16x128xi1>, vector<16x128xf32>
    %c15_i32_62 = arith.constant 15 : i32
    %286 = tpu.dynamic_rotate %194 by %c15_i32_62 dim 0 : vector<16x128xf32>, i32 -> vector<16x128xf32>
    %287 = vector.shape_cast %281 : vector<1x128xf32> to vector<1x128xf32>
    %288 = vector.broadcast %287 : vector<1x128xf32> to vector<16x128xf32>
    %289 = arith.select %8, %288, %286 : vector<16x128xi1>, vector<16x128xf32>
    %290 = arith.subf %192, %285 : vector<16x128xf32>
    %291 = math.absf %290 : vector<16x128xf32>
    %292 = arith.subf %194, %289 : vector<16x128xf32>
    %293 = math.absf %292 : vector<16x128xf32>
    %294 = vector.shape_cast %291 : vector<16x128xf32> to vector<1x16x128xf32>
    %cst_63 = arith.constant dense<0.000000e+00> : vector<1xf32>
    %295 = vector.multi_reduction <add>, %294, %cst_63 [1, 2] : vector<1x16x128xf32> to vector<1xf32>
    %296 = vector.shape_cast %295 : vector<1xf32> to vector<1x1x1xf32>
    %297 = vector.extract %296[0, 0, 0] : f32 from vector<1x1x1xf32>
    %298 = vector.broadcast %297 : f32 to vector<1x1xf32>
    %299 = vector.shape_cast %293 : vector<16x128xf32> to vector<1x16x128xf32>
    %cst_64 = arith.constant dense<0.000000e+00> : vector<1xf32>
    %300 = vector.multi_reduction <add>, %299, %cst_64 [1, 2] : vector<1x16x128xf32> to vector<1xf32>
    %301 = vector.shape_cast %300 : vector<1xf32> to vector<1x1x1xf32>
    %302 = vector.extract %301[0, 0, 0] : f32 from vector<1x1x1xf32>
    %303 = vector.broadcast %302 : f32 to vector<1x1xf32>
    %304 = arith.mulf %291, %291 : vector<16x128xf32>
    %305 = vector.shape_cast %304 : vector<16x128xf32> to vector<1x16x128xf32>
    %cst_65 = arith.constant dense<0.000000e+00> : vector<1xf32>
    %306 = vector.multi_reduction <add>, %305, %cst_65 [1, 2] : vector<1x16x128xf32> to vector<1xf32>
    %307 = vector.shape_cast %306 : vector<1xf32> to vector<1x1x1xf32>
    %308 = vector.extract %307[0, 0, 0] : f32 from vector<1x1x1xf32>
    %309 = vector.broadcast %308 : f32 to vector<1x1xf32>
    %310 = arith.mulf %293, %293 : vector<16x128xf32>
    %311 = vector.shape_cast %310 : vector<16x128xf32> to vector<1x16x128xf32>
    %cst_66 = arith.constant dense<0.000000e+00> : vector<1xf32>
    %312 = vector.multi_reduction <add>, %311, %cst_66 [1, 2] : vector<1x16x128xf32> to vector<1xf32>
    %313 = vector.shape_cast %312 : vector<1xf32> to vector<1x1x1xf32>
    %314 = vector.extract %313[0, 0, 0] : f32 from vector<1x1x1xf32>
    %315 = vector.broadcast %314 : f32 to vector<1x1xf32>
    %316 = arith.mulf %291, %293 : vector<16x128xf32>
    %317 = vector.shape_cast %316 : vector<16x128xf32> to vector<1x16x128xf32>
    %cst_67 = arith.constant dense<0.000000e+00> : vector<1xf32>
    %318 = vector.multi_reduction <add>, %317, %cst_67 [1, 2] : vector<1x16x128xf32> to vector<1xf32>
    %319 = vector.shape_cast %318 : vector<1xf32> to vector<1x1x1xf32>
    %320 = vector.extract %319[0, 0, 0] : f32 from vector<1x1x1xf32>
    %321 = vector.broadcast %320 : f32 to vector<1x1xf32>
    %322 = vector.shape_cast %291 : vector<16x128xf32> to vector<1x16x128xf32>
    %cst_68 = arith.constant dense<0x7F800000> : vector<1xf32>
    %323 = vector.multi_reduction <minimumf>, %322, %cst_68 [1, 2] : vector<1x16x128xf32> to vector<1xf32>
    %324 = vector.shape_cast %323 : vector<1xf32> to vector<1x1x1xf32>
    %325 = vector.extract %324[0, 0, 0] : f32 from vector<1x1x1xf32>
    %326 = vector.broadcast %325 : f32 to vector<1x1xf32>
    %327 = vector.shape_cast %293 : vector<16x128xf32> to vector<1x16x128xf32>
    %cst_69 = arith.constant dense<0x7F800000> : vector<1xf32>
    %328 = vector.multi_reduction <minimumf>, %327, %cst_69 [1, 2] : vector<1x16x128xf32> to vector<1xf32>
    %329 = vector.shape_cast %328 : vector<1xf32> to vector<1x1x1xf32>
    %330 = vector.extract %329[0, 0, 0] : f32 from vector<1x1x1xf32>
    %331 = vector.broadcast %330 : f32 to vector<1x1xf32>
    %c512_i32 = arith.constant 512 : i32
    %332 = vector.broadcast %c512_i32 : i32 to vector<8x128xi32>
    %333 = arith.cmpi eq, %13, %332 : vector<8x128xi32>
    %334 = vector.shape_cast %298 : vector<1x1xf32> to vector<1x1xf32>
    %335 = vector.broadcast %334 : vector<1x1xf32> to vector<8x128xf32>
    %336 = arith.select %333, %335, %277 : vector<8x128xi1>, vector<8x128xf32>
    %c513_i32 = arith.constant 513 : i32
    %337 = vector.broadcast %c513_i32 : i32 to vector<8x128xi32>
    %338 = arith.cmpi eq, %13, %337 : vector<8x128xi32>
    %339 = vector.shape_cast %303 : vector<1x1xf32> to vector<1x1xf32>
    %340 = vector.broadcast %339 : vector<1x1xf32> to vector<8x128xf32>
    %341 = arith.select %338, %340, %336 : vector<8x128xi1>, vector<8x128xf32>
    %c514_i32 = arith.constant 514 : i32
    %342 = vector.broadcast %c514_i32 : i32 to vector<8x128xi32>
    %343 = arith.cmpi eq, %13, %342 : vector<8x128xi32>
    %344 = vector.shape_cast %309 : vector<1x1xf32> to vector<1x1xf32>
    %345 = vector.broadcast %344 : vector<1x1xf32> to vector<8x128xf32>
    %346 = arith.select %343, %345, %341 : vector<8x128xi1>, vector<8x128xf32>
    %c515_i32 = arith.constant 515 : i32
    %347 = vector.broadcast %c515_i32 : i32 to vector<8x128xi32>
    %348 = arith.cmpi eq, %13, %347 : vector<8x128xi32>
    %349 = vector.shape_cast %315 : vector<1x1xf32> to vector<1x1xf32>
    %350 = vector.broadcast %349 : vector<1x1xf32> to vector<8x128xf32>
    %351 = arith.select %348, %350, %346 : vector<8x128xi1>, vector<8x128xf32>
    %c516_i32 = arith.constant 516 : i32
    %352 = vector.broadcast %c516_i32 : i32 to vector<8x128xi32>
    %353 = arith.cmpi eq, %13, %352 : vector<8x128xi32>
    %354 = vector.shape_cast %321 : vector<1x1xf32> to vector<1x1xf32>
    %355 = vector.broadcast %354 : vector<1x1xf32> to vector<8x128xf32>
    %356 = arith.select %353, %355, %351 : vector<8x128xi1>, vector<8x128xf32>
    %c517_i32 = arith.constant 517 : i32
    %357 = vector.broadcast %c517_i32 : i32 to vector<8x128xi32>
    %358 = arith.cmpi eq, %13, %357 : vector<8x128xi32>
    %359 = vector.shape_cast %326 : vector<1x1xf32> to vector<1x1xf32>
    %360 = vector.broadcast %359 : vector<1x1xf32> to vector<8x128xf32>
    %361 = arith.select %358, %360, %356 : vector<8x128xi1>, vector<8x128xf32>
    %c518_i32 = arith.constant 518 : i32
    %362 = vector.broadcast %c518_i32 : i32 to vector<8x128xi32>
    %363 = arith.cmpi eq, %13, %362 : vector<8x128xi32>
    %364 = vector.shape_cast %331 : vector<1x1xf32> to vector<1x1xf32>
    %365 = vector.broadcast %364 : vector<1x1xf32> to vector<8x128xf32>
    %366 = arith.select %363, %365, %361 : vector<8x128xi1>, vector<8x128xf32>
    %c0_70 = arith.constant 0 : index
    %c2 = arith.constant 2 : index
    %c0_71 = arith.constant 0 : index
    %c0_72 = arith.constant 0 : index
    %367 = vector.load %arg2[%c0_70, %c2, %c0_71, %c0_72] : memref<1x3x16x128xf32, #tpu.memory_space<vmem>>, vector<1x1x16x128xf32>
    %368 = vector.shape_cast %367 : vector<1x1x16x128xf32> to vector<16x128xf32>
    %c0_73 = arith.constant 0 : index
    %c2_74 = arith.constant 2 : index
    %c0_75 = arith.constant 0 : index
    %c0_76 = arith.constant 0 : index
    %369 = vector.load %arg3[%c0_73, %c2_74, %c0_75, %c0_76] : memref<1x3x16x128xf32, #tpu.memory_space<vmem>>, vector<1x1x16x128xf32>
    %370 = vector.shape_cast %369 : vector<1x1x16x128xf32> to vector<16x128xf32>
    %c127_i32_77 = arith.constant 127 : i32
    %371 = tpu.dynamic_rotate %368 by %c127_i32_77 dim 1 : vector<16x128xf32>, i32 -> vector<16x128xf32>
    %cst_78 = arith.constant 0.000000e+00 : f32
    %372 = vector.broadcast %cst_78 : f32 to vector<16x128xf32>
    %373 = arith.select %4, %371, %372 : vector<16x128xi1>, vector<16x128xf32>
    %c127_i32_79 = arith.constant 127 : i32
    %374 = tpu.dynamic_rotate %370 by %c127_i32_79 dim 1 : vector<16x128xf32>, i32 -> vector<16x128xf32>
    %cst_80 = arith.constant 0.000000e+00 : f32
    %375 = vector.broadcast %cst_80 : f32 to vector<16x128xf32>
    %376 = arith.select %4, %374, %375 : vector<16x128xi1>, vector<16x128xf32>
    %377 = arith.subf %368, %373 : vector<16x128xf32>
    %378 = math.absf %377 : vector<16x128xf32>
    %379 = arith.subf %370, %376 : vector<16x128xf32>
    %380 = math.absf %379 : vector<16x128xf32>
    %381 = vector.shape_cast %378 : vector<16x128xf32> to vector<1x16x128xf32>
    %cst_81 = arith.constant dense<0.000000e+00> : vector<1xf32>
    %382 = vector.multi_reduction <add>, %381, %cst_81 [1, 2] : vector<1x16x128xf32> to vector<1xf32>
    %383 = vector.shape_cast %382 : vector<1xf32> to vector<1x1x1xf32>
    %384 = vector.extract %383[0, 0, 0] : f32 from vector<1x1x1xf32>
    %385 = vector.broadcast %384 : f32 to vector<1x1xf32>
    %386 = vector.shape_cast %380 : vector<16x128xf32> to vector<1x16x128xf32>
    %cst_82 = arith.constant dense<0.000000e+00> : vector<1xf32>
    %387 = vector.multi_reduction <add>, %386, %cst_82 [1, 2] : vector<1x16x128xf32> to vector<1xf32>
    %388 = vector.shape_cast %387 : vector<1xf32> to vector<1x1x1xf32>
    %389 = vector.extract %388[0, 0, 0] : f32 from vector<1x1x1xf32>
    %390 = vector.broadcast %389 : f32 to vector<1x1xf32>
    %391 = arith.mulf %378, %378 : vector<16x128xf32>
    %392 = vector.shape_cast %391 : vector<16x128xf32> to vector<1x16x128xf32>
    %cst_83 = arith.constant dense<0.000000e+00> : vector<1xf32>
    %393 = vector.multi_reduction <add>, %392, %cst_83 [1, 2] : vector<1x16x128xf32> to vector<1xf32>
    %394 = vector.shape_cast %393 : vector<1xf32> to vector<1x1x1xf32>
    %395 = vector.extract %394[0, 0, 0] : f32 from vector<1x1x1xf32>
    %396 = vector.broadcast %395 : f32 to vector<1x1xf32>
    %397 = arith.mulf %380, %380 : vector<16x128xf32>
    %398 = vector.shape_cast %397 : vector<16x128xf32> to vector<1x16x128xf32>
    %cst_84 = arith.constant dense<0.000000e+00> : vector<1xf32>
    %399 = vector.multi_reduction <add>, %398, %cst_84 [1, 2] : vector<1x16x128xf32> to vector<1xf32>
    %400 = vector.shape_cast %399 : vector<1xf32> to vector<1x1x1xf32>
    %401 = vector.extract %400[0, 0, 0] : f32 from vector<1x1x1xf32>
    %402 = vector.broadcast %401 : f32 to vector<1x1xf32>
    %403 = arith.mulf %378, %380 : vector<16x128xf32>
    %404 = vector.shape_cast %403 : vector<16x128xf32> to vector<1x16x128xf32>
    %cst_85 = arith.constant dense<0.000000e+00> : vector<1xf32>
    %405 = vector.multi_reduction <add>, %404, %cst_85 [1, 2] : vector<1x16x128xf32> to vector<1xf32>
    %406 = vector.shape_cast %405 : vector<1xf32> to vector<1x1x1xf32>
    %407 = vector.extract %406[0, 0, 0] : f32 from vector<1x1x1xf32>
    %408 = vector.broadcast %407 : f32 to vector<1x1xf32>
    %409 = vector.shape_cast %378 : vector<16x128xf32> to vector<1x16x128xf32>
    %cst_86 = arith.constant dense<0x7F800000> : vector<1xf32>
    %410 = vector.multi_reduction <minimumf>, %409, %cst_86 [1, 2] : vector<1x16x128xf32> to vector<1xf32>
    %411 = vector.shape_cast %410 : vector<1xf32> to vector<1x1x1xf32>
    %412 = vector.extract %411[0, 0, 0] : f32 from vector<1x1x1xf32>
    %413 = vector.broadcast %412 : f32 to vector<1x1xf32>
    %414 = vector.shape_cast %380 : vector<16x128xf32> to vector<1x16x128xf32>
    %cst_87 = arith.constant dense<0x7F800000> : vector<1xf32>
    %415 = vector.multi_reduction <minimumf>, %414, %cst_87 [1, 2] : vector<1x16x128xf32> to vector<1xf32>
    %416 = vector.shape_cast %415 : vector<1xf32> to vector<1x1x1xf32>
    %417 = vector.extract %416[0, 0, 0] : f32 from vector<1x1x1xf32>
    %418 = vector.broadcast %417 : f32 to vector<1x1xf32>
    %c256_i32 = arith.constant 256 : i32
    %419 = vector.broadcast %c256_i32 : i32 to vector<8x128xi32>
    %420 = arith.cmpi eq, %13, %419 : vector<8x128xi32>
    %421 = vector.shape_cast %385 : vector<1x1xf32> to vector<1x1xf32>
    %422 = vector.broadcast %421 : vector<1x1xf32> to vector<8x128xf32>
    %423 = arith.select %420, %422, %366 : vector<8x128xi1>, vector<8x128xf32>
    %c257_i32 = arith.constant 257 : i32
    %424 = vector.broadcast %c257_i32 : i32 to vector<8x128xi32>
    %425 = arith.cmpi eq, %13, %424 : vector<8x128xi32>
    %426 = vector.shape_cast %390 : vector<1x1xf32> to vector<1x1xf32>
    %427 = vector.broadcast %426 : vector<1x1xf32> to vector<8x128xf32>
    %428 = arith.select %425, %427, %423 : vector<8x128xi1>, vector<8x128xf32>
    %c258_i32 = arith.constant 258 : i32
    %429 = vector.broadcast %c258_i32 : i32 to vector<8x128xi32>
    %430 = arith.cmpi eq, %13, %429 : vector<8x128xi32>
    %431 = vector.shape_cast %396 : vector<1x1xf32> to vector<1x1xf32>
    %432 = vector.broadcast %431 : vector<1x1xf32> to vector<8x128xf32>
    %433 = arith.select %430, %432, %428 : vector<8x128xi1>, vector<8x128xf32>
    %c259_i32 = arith.constant 259 : i32
    %434 = vector.broadcast %c259_i32 : i32 to vector<8x128xi32>
    %435 = arith.cmpi eq, %13, %434 : vector<8x128xi32>
    %436 = vector.shape_cast %402 : vector<1x1xf32> to vector<1x1xf32>
    %437 = vector.broadcast %436 : vector<1x1xf32> to vector<8x128xf32>
    %438 = arith.select %435, %437, %433 : vector<8x128xi1>, vector<8x128xf32>
    %c260_i32 = arith.constant 260 : i32
    %439 = vector.broadcast %c260_i32 : i32 to vector<8x128xi32>
    %440 = arith.cmpi eq, %13, %439 : vector<8x128xi32>
    %441 = vector.shape_cast %408 : vector<1x1xf32> to vector<1x1xf32>
    %442 = vector.broadcast %441 : vector<1x1xf32> to vector<8x128xf32>
    %443 = arith.select %440, %442, %438 : vector<8x128xi1>, vector<8x128xf32>
    %c261_i32 = arith.constant 261 : i32
    %444 = vector.broadcast %c261_i32 : i32 to vector<8x128xi32>
    %445 = arith.cmpi eq, %13, %444 : vector<8x128xi32>
    %446 = vector.shape_cast %413 : vector<1x1xf32> to vector<1x1xf32>
    %447 = vector.broadcast %446 : vector<1x1xf32> to vector<8x128xf32>
    %448 = arith.select %445, %447, %443 : vector<8x128xi1>, vector<8x128xf32>
    %c262_i32 = arith.constant 262 : i32
    %449 = vector.broadcast %c262_i32 : i32 to vector<8x128xi32>
    %450 = arith.cmpi eq, %13, %449 : vector<8x128xi32>
    %451 = vector.shape_cast %418 : vector<1x1xf32> to vector<1x1xf32>
    %452 = vector.broadcast %451 : vector<1x1xf32> to vector<8x128xf32>
    %453 = arith.select %450, %452, %448 : vector<8x128xi1>, vector<8x128xf32>
    %c0_88 = arith.constant 0 : index
    %c0_89 = arith.constant 0 : index
    %c2_90 = arith.constant 2 : index
    %c0_91 = arith.constant 0 : index
    %454 = vector.load %arg4[%c0_88, %c0_89, %c2_90, %c0_91] : memref<1x1x6x128xf32, #tpu.memory_space<vmem>>, vector<1x1x1x128xf32>
    %455 = vector.shape_cast %454 : vector<1x1x1x128xf32> to vector<1x128xf32>
    %c0_92 = arith.constant 0 : index
    %c0_93 = arith.constant 0 : index
    %c5 = arith.constant 5 : index
    %c0_94 = arith.constant 0 : index
    %456 = vector.load %arg4[%c0_92, %c0_93, %c5, %c0_94] : memref<1x1x6x128xf32, #tpu.memory_space<vmem>>, vector<1x1x1x128xf32>
    %457 = vector.shape_cast %456 : vector<1x1x1x128xf32> to vector<1x128xf32>
    %c15_i32_95 = arith.constant 15 : i32
    %458 = tpu.dynamic_rotate %368 by %c15_i32_95 dim 0 : vector<16x128xf32>, i32 -> vector<16x128xf32>
    %459 = vector.shape_cast %455 : vector<1x128xf32> to vector<1x128xf32>
    %460 = vector.broadcast %459 : vector<1x128xf32> to vector<16x128xf32>
    %461 = arith.select %8, %460, %458 : vector<16x128xi1>, vector<16x128xf32>
    %c15_i32_96 = arith.constant 15 : i32
    %462 = tpu.dynamic_rotate %370 by %c15_i32_96 dim 0 : vector<16x128xf32>, i32 -> vector<16x128xf32>
    %463 = vector.shape_cast %457 : vector<1x128xf32> to vector<1x128xf32>
    %464 = vector.broadcast %463 : vector<1x128xf32> to vector<16x128xf32>
    %465 = arith.select %8, %464, %462 : vector<16x128xi1>, vector<16x128xf32>
    %466 = arith.subf %368, %461 : vector<16x128xf32>
    %467 = math.absf %466 : vector<16x128xf32>
    %468 = arith.subf %370, %465 : vector<16x128xf32>
    %469 = math.absf %468 : vector<16x128xf32>
    %470 = vector.shape_cast %467 : vector<16x128xf32> to vector<1x16x128xf32>
    %cst_97 = arith.constant dense<0.000000e+00> : vector<1xf32>
    %471 = vector.multi_reduction <add>, %470, %cst_97 [1, 2] : vector<1x16x128xf32> to vector<1xf32>
    %472 = vector.shape_cast %471 : vector<1xf32> to vector<1x1x1xf32>
    %473 = vector.extract %472[0, 0, 0] : f32 from vector<1x1x1xf32>
    %474 = vector.broadcast %473 : f32 to vector<1x1xf32>
    %475 = vector.shape_cast %469 : vector<16x128xf32> to vector<1x16x128xf32>
    %cst_98 = arith.constant dense<0.000000e+00> : vector<1xf32>
    %476 = vector.multi_reduction <add>, %475, %cst_98 [1, 2] : vector<1x16x128xf32> to vector<1xf32>
    %477 = vector.shape_cast %476 : vector<1xf32> to vector<1x1x1xf32>
    %478 = vector.extract %477[0, 0, 0] : f32 from vector<1x1x1xf32>
    %479 = vector.broadcast %478 : f32 to vector<1x1xf32>
    %480 = arith.mulf %467, %467 : vector<16x128xf32>
    %481 = vector.shape_cast %480 : vector<16x128xf32> to vector<1x16x128xf32>
    %cst_99 = arith.constant dense<0.000000e+00> : vector<1xf32>
    %482 = vector.multi_reduction <add>, %481, %cst_99 [1, 2] : vector<1x16x128xf32> to vector<1xf32>
    %483 = vector.shape_cast %482 : vector<1xf32> to vector<1x1x1xf32>
    %484 = vector.extract %483[0, 0, 0] : f32 from vector<1x1x1xf32>
    %485 = vector.broadcast %484 : f32 to vector<1x1xf32>
    %486 = arith.mulf %469, %469 : vector<16x128xf32>
    %487 = vector.shape_cast %486 : vector<16x128xf32> to vector<1x16x128xf32>
    %cst_100 = arith.constant dense<0.000000e+00> : vector<1xf32>
    %488 = vector.multi_reduction <add>, %487, %cst_100 [1, 2] : vector<1x16x128xf32> to vector<1xf32>
    %489 = vector.shape_cast %488 : vector<1xf32> to vector<1x1x1xf32>
    %490 = vector.extract %489[0, 0, 0] : f32 from vector<1x1x1xf32>
    %491 = vector.broadcast %490 : f32 to vector<1x1xf32>
    %492 = arith.mulf %467, %469 : vector<16x128xf32>
    %493 = vector.shape_cast %492 : vector<16x128xf32> to vector<1x16x128xf32>
    %cst_101 = arith.constant dense<0.000000e+00> : vector<1xf32>
    %494 = vector.multi_reduction <add>, %493, %cst_101 [1, 2] : vector<1x16x128xf32> to vector<1xf32>
    %495 = vector.shape_cast %494 : vector<1xf32> to vector<1x1x1xf32>
    %496 = vector.extract %495[0, 0, 0] : f32 from vector<1x1x1xf32>
    %497 = vector.broadcast %496 : f32 to vector<1x1xf32>
    %498 = vector.shape_cast %467 : vector<16x128xf32> to vector<1x16x128xf32>
    %cst_102 = arith.constant dense<0x7F800000> : vector<1xf32>
    %499 = vector.multi_reduction <minimumf>, %498, %cst_102 [1, 2] : vector<1x16x128xf32> to vector<1xf32>
    %500 = vector.shape_cast %499 : vector<1xf32> to vector<1x1x1xf32>
    %501 = vector.extract %500[0, 0, 0] : f32 from vector<1x1x1xf32>
    %502 = vector.broadcast %501 : f32 to vector<1x1xf32>
    %503 = vector.shape_cast %469 : vector<16x128xf32> to vector<1x16x128xf32>
    %cst_103 = arith.constant dense<0x7F800000> : vector<1xf32>
    %504 = vector.multi_reduction <minimumf>, %503, %cst_103 [1, 2] : vector<1x16x128xf32> to vector<1xf32>
    %505 = vector.shape_cast %504 : vector<1xf32> to vector<1x1x1xf32>
    %506 = vector.extract %505[0, 0, 0] : f32 from vector<1x1x1xf32>
    %507 = vector.broadcast %506 : f32 to vector<1x1xf32>
    %c640_i32 = arith.constant 640 : i32
    %508 = vector.broadcast %c640_i32 : i32 to vector<8x128xi32>
    %509 = arith.cmpi eq, %13, %508 : vector<8x128xi32>
    %510 = vector.shape_cast %474 : vector<1x1xf32> to vector<1x1xf32>
    %511 = vector.broadcast %510 : vector<1x1xf32> to vector<8x128xf32>
    %512 = arith.select %509, %511, %453 : vector<8x128xi1>, vector<8x128xf32>
    %c641_i32 = arith.constant 641 : i32
    %513 = vector.broadcast %c641_i32 : i32 to vector<8x128xi32>
    %514 = arith.cmpi eq, %13, %513 : vector<8x128xi32>
    %515 = vector.shape_cast %479 : vector<1x1xf32> to vector<1x1xf32>
    %516 = vector.broadcast %515 : vector<1x1xf32> to vector<8x128xf32>
    %517 = arith.select %514, %516, %512 : vector<8x128xi1>, vector<8x128xf32>
    %c642_i32 = arith.constant 642 : i32
    %518 = vector.broadcast %c642_i32 : i32 to vector<8x128xi32>
    %519 = arith.cmpi eq, %13, %518 : vector<8x128xi32>
    %520 = vector.shape_cast %485 : vector<1x1xf32> to vector<1x1xf32>
    %521 = vector.broadcast %520 : vector<1x1xf32> to vector<8x128xf32>
    %522 = arith.select %519, %521, %517 : vector<8x128xi1>, vector<8x128xf32>
    %c643_i32 = arith.constant 643 : i32
    %523 = vector.broadcast %c643_i32 : i32 to vector<8x128xi32>
    %524 = arith.cmpi eq, %13, %523 : vector<8x128xi32>
    %525 = vector.shape_cast %491 : vector<1x1xf32> to vector<1x1xf32>
    %526 = vector.broadcast %525 : vector<1x1xf32> to vector<8x128xf32>
    %527 = arith.select %524, %526, %522 : vector<8x128xi1>, vector<8x128xf32>
    %c644_i32 = arith.constant 644 : i32
    %528 = vector.broadcast %c644_i32 : i32 to vector<8x128xi32>
    %529 = arith.cmpi eq, %13, %528 : vector<8x128xi32>
    %530 = vector.shape_cast %497 : vector<1x1xf32> to vector<1x1xf32>
    %531 = vector.broadcast %530 : vector<1x1xf32> to vector<8x128xf32>
    %532 = arith.select %529, %531, %527 : vector<8x128xi1>, vector<8x128xf32>
    %c645_i32 = arith.constant 645 : i32
    %533 = vector.broadcast %c645_i32 : i32 to vector<8x128xi32>
    %534 = arith.cmpi eq, %13, %533 : vector<8x128xi32>
    %535 = vector.shape_cast %502 : vector<1x1xf32> to vector<1x1xf32>
    %536 = vector.broadcast %535 : vector<1x1xf32> to vector<8x128xf32>
    %537 = arith.select %534, %536, %532 : vector<8x128xi1>, vector<8x128xf32>
    %c646_i32 = arith.constant 646 : i32
    %538 = vector.broadcast %c646_i32 : i32 to vector<8x128xi32>
    %539 = arith.cmpi eq, %13, %538 : vector<8x128xi32>
    %540 = vector.shape_cast %507 : vector<1x1xf32> to vector<1x1xf32>
    %541 = vector.broadcast %540 : vector<1x1xf32> to vector<8x128xf32>
    %542 = arith.select %539, %541, %537 : vector<8x128xi1>, vector<8x128xf32>
    %c0_104 = arith.constant 0 : index
    %c0_105 = arith.constant 0 : index
    %c0_106 = arith.constant 0 : index
    %c0_107 = arith.constant 0 : index
    %543 = vector.load %arg5[%c0_104, %c0_105, %c0_106, %c0_107] : memref<1x1x8x128xf32, #tpu.memory_space<vmem>>, vector<1x1x8x128xf32>
    %544 = vector.shape_cast %543 : vector<1x1x8x128xf32> to vector<8x128xf32>
    %545 = vector.shape_cast %542 : vector<8x128xf32> to vector<1x1x8x128xf32>
    tpu.vector_store %arg5[%c0_104, %c0_105, %c0_106, %c0_107], %545 {strides = array<i32>} : memref<1x1x8x128xf32, #tpu.memory_space<vmem>>, vector<1x1x8x128xf32>,
    return
  }
  func.func @transform_0(%arg0: i32, %arg1: i32) -> (i32, i32, i32, i32) {
    %c0_i32 = arith.constant 0 : i32
    %c0_i32_0 = arith.constant 0 : i32
    %c0_i32_1 = arith.constant 0 : i32
    return %arg0, %c0_i32, %arg1, %c0_i32_0 : i32, i32, i32, i32
  }
  func.func @transform_1(%arg0: i32, %arg1: i32) -> (i32, i32, i32, i32) {
    %c0_i32 = arith.constant 0 : i32
    %c0_i32_0 = arith.constant 0 : i32
    %c0_i32_1 = arith.constant 0 : i32
    return %arg0, %c0_i32, %arg1, %c0_i32_0 : i32, i32, i32, i32
  }
  func.func @transform_2(%arg0: i32, %arg1: i32) -> (i32, i32, i32, i32) {
    %c0_i32 = arith.constant 0 : i32
    %c0_i32_0 = arith.constant 0 : i32
    %c0_i32_1 = arith.constant 0 : i32
    return %arg0, %arg1, %c0_i32, %c0_i32_0 : i32, i32, i32, i32
  }
  func.func @transform_3(%arg0: i32, %arg1: i32) -> (i32, i32, i32, i32) {
    %c0_i32 = arith.constant 0 : i32
    %c0_i32_0 = arith.constant 0 : i32
    %c0_i32_1 = arith.constant 0 : i32
    return %arg0, %arg1, %c0_i32, %c0_i32_0 : i32, i32, i32, i32
  }
}

</mosaic_0001>

<bundles_post_ra>
// kernel: l_grad_cosist.1
= control target key start
LH: loop header
LB: loop body
LE: loop exit
PB: predicated region body
PF: predicated region fallthrough
CT: control target
= control target key end

     0   :  { %8 = vsyncpa [#allocation3], 0  ;;  %s1881_s0 = inlined_call_operand.hbm [shape: f32[2,3,16,128], index: 0, kind: input, shape index: {}]   ;;  %s1882_s1 = inlined_call_operand.hbm [shape: f32[2,3,16,128], index: 1, kind: input, shape index: {}]   ;;  %s1883_s2 = inlined_call_operand.vmem [shape: f32[2,1,6,128], index: 2, kind: input, shape index: {}]   ;;  %s1884_s3 = inlined_call_operand.vmem [shape: f32[2,1,8,128], index: 3, kind: output, shape index: {}]  }
   0x1   :  { %10 = vsyncpa [#allocation3 + $0x1], 0 }
   0x2   :  { %11 = vsyncpa [#allocation5], 0 }
   0x3   :  { %13 = vsyncpa [#allocation5 + $0x1], 0  ;;  %s1481_s12 = smov 0   ;;  %s1483_s13 = smov 0  }
   0x4   :  { %s1485_s14 = smov 0   ;;  %s1487_s15 = smov 0  }
   0x5   :  { %s1489_s16 = smov 0   ;;  %s1491_s17 = smov 0  }
   0x6 LB: > { %s1165_s18 = sadd.s32 4294967295, %s1456_s17   ;;  %s31_s19 = sadd.s32 1, %s1452_s16  ;;  %s1456_s17 = sphi %s1491_s17, %s19_s17   ;;  %s1452_s16 = sphi %s1489_s16, %s1891_s16   ;;  %s1448_s15 = sphi %s1487_s15, %s1890_s15   ;;  %s1444_s14 = sphi %s1485_s14, %s1889_s14   ;;  %s1440_s13 = sphi %s1483_s13, %s1888_s13   ;;  %s1436_s12 = sphi %s1481_s12, %s1887_s12  }
   0x7   : > { %p33_p0 = scmp.ge.s32.totalorder %s31_s19, 2  ;;  %s40_s20 = sadd.s32 1, %s1444_s14 }
   0x8   : > { %p47_p1 = scmp.ne.s32.totalorder %s1444_s14, %s1440_s13  ;;  %p48_p2 = scmp.eq.s32.totalorder %s1456_s17, 0 }
   0x9   : > { %s1893_s19 = smov (%p33_p0, %s31_s19), 0  ;;  %p53_p4 = scmp.ne.s32.totalorder %s1440_s13, %s1436_s12 }
   0xa   : > { %p49_p3 = por %p48_p2, %p47_p1  ;;  %s35_s21 = ssub.s32 %s1452_s16, %s1893_s19 }
   0xb   : > { %p54_p5 = scmp.eq.s32.totalorder %s1165_s18, 0  ;;  %p38_p6 = scmp.eq.s32.totalorder %s35_s21, 0 }
   0xc   : > { %p1284_p8 = scmp.lt.s32.totalorder %s1456_s17, 2  ;;  %s1529_s24 = sand.u32 1, %s1444_s14  }
   0xd   : > { %p1520_p7 = por %p54_p5, %p53_p4  ;;  %s1185_s25 = smul.u32 48, %s1452_s16 }
   0xe   : > { %s1526_s23 = scalar_select %p38_p6, %s1444_s14, %s40_s20  }
   0xf   : > { %s1184_s26 = smul.u32 48, %s1529_s24  ;;  %s172_s29 = scalar_lea.hbm %s1881_s0, %s1185_s25 }
  0x10   : > { %p1536_p9 = pnand %p1284_p8, %p49_p3  ;;  %s173_s4 = sshll.u32 %s172_s29, 4  ;;  %s174_s4 = int_to_ptr.hbm [resolvable:$true] %s173_s4 }
  0x11   : > { %s165_s5 = scalar_lea.vmem [#allocation2], %s1184_s26  ;;  %s162_s7 = scalar_lea.sflag [#allocation3], %s1529_s24 }
  0x12   : > { %s175_s6 = sshll.u32 %s165_s5, 4  ;;  %s1458_s8 = smov 128   ;;  %s176_s6 = int_to_ptr.vmem [resolvable:$true] %s175_s6 }
  0x13   : > { %s1459_s9 = smov 8   ;;  %p1171_p10 = scmp.ge.s32.totalorder %s1456_s17, 1 }
  0x14   : > { %1280 = dma.hbm_to_vmem [thread:$0]  (!%p1536_p9), %s174_s4, 768, %s176_s6, %s162_s7, %s1458_s8, %s1458_s8, %s1459_s9  }
  0x15   : > { %p217_p11 = scmp.lt.s32.totalorder %s1456_s17, 3  ;;  %s196_s12 = scalar_lea.hbm %s1882_s1, %s1185_s25 }
  0x16   : > { %s197_s18 = sshll.u32 %s196_s12, 4  ;;  %s189_s20 = scalar_lea.vmem [#allocation4], %s1184_s26  ;;  %s198_s18 = int_to_ptr.hbm [resolvable:$true] %s197_s18 }
  0x17   : > { %p218_p12 = pnand %p1171_p10, %p217_p11  ;;  %s199_s21 = sshll.u32 %s189_s20, 4  ;;  %s200_s21 = int_to_ptr.vmem [resolvable:$true] %s199_s21 }
  0x18   : > { %s186_s27 = scalar_lea.sflag [#allocation5], %s1529_s24  ;;  %s223_s28 = sand.u32 (!%p218_p12), 1, %s1440_s13  }
  0x19   : > { %1283 = dma.hbm_to_vmem [thread:$0]  (!%p1536_p9), %s198_s18, 768, %s200_s21, %s186_s27, %s1458_s8, %s1458_s8, %s1459_s9  }
  0x1a   : > { %221 = sbr.rel (%p218_p12) target bundleno = 428 (0x1ac), region = 32  ;;  %s224_s4 = scalar_lea.sflag (!%p218_p12), [#allocation3], %s223_s28 }
  0x1b   : > { %s1188_s29 = smul.u32 (!%p218_p12), 48, %s223_s28 }
  0x1d   : > { %s1552_s5 = scalar_lea.vmem (!%p218_p12), [#allocation2], %s1188_s29 }
  0x1f   : > { %1427 = dma.done.wait (%p1520_p7), %s224_s4, 768  }
  0x20   : > { %1429 = vsyncadd (%p1520_p7), %s224_s4, 4294966528  ;;  %s234_s25 = scalar_lea.sflag [#allocation5], %s223_s28  ;;  %s1558_s26 = scalar_lea.vmem [#allocation4], %s1188_s29 }
  0x21   : > { %1431 = dma.done.wait (%p1520_p7), %s234_s25, 768  }
  0x22   : > { %1433 = vsyncadd (%p1520_p7), %s234_s25, 4294966528  ;;  %p277_p13 = scmp.lt.s32.totalorder %s1448_s15, 1  ;;  %v292_v0 = vlaneseq  ;;  %v1578_v5 = vld [vmem:[%s1558_s26] sm:$0xff]  ;;  %s1460_s7 = smov 127   ;;  %v1593_v7 = vld [vmem:[%s1558_s26 + $0x8] sm:$0xff] }
  0x23   : > { %v1581_v6 = vld [vmem:[%s1552_s5] sm:$0xff]  ;;  %316 = vrot.lane.b32.xlu1 %v1578_v5, %s1460_s7  ;;  %v1596_v8 = vld [vmem:[%s1552_s5 + $0x8] sm:$0xff]  ;;  %v1599_v9 = vld [vmem:[%s1552_s5 + $0x10] sm:$0xff]  ;;  %v437_v21 = vrot.slane %v1578_v5, 1  ;;  %v438_v22 = vrot.slane %v1593_v7, 1 }
  0x24   : > { %s1895_s15 = smov (!%p277_p13, %s1448_s15), 1  ;;  %v1568_v1 = vshrl.u32 %v292_v0, 7  ;;  %v1571_v2 = vand.u32 127, %v292_v0  ;;  %310 = vrot.lane.b32.xlu0 %v1581_v6, %s1460_s7  ;;  %555 = vrot.lane.b32.xlu2 %v1599_v9, %s1460_s7  ;;  %v1605_v10 = vld [vmem:[%s1558_s26 + $0x28] sm:$0xff]  ;;  %v1608_v11 = vld [vmem:[%s1558_s26 + $0x10] sm:$0xff]  ;;  %v429_v17 = vrot.slane %v1581_v6, 1 }
  0x25   : > { %s1172_s24 = sshll.u32 %s1895_s15, 3  ;;  %v1611_v12 = vld [vmem:[%s1552_s5 + $0x18] sm:$0xff]  ;;  %v1620_v14 = vld [vmem:[%s1552_s5 + $0x20] sm:$0xff]  ;;  %v1628_v16 = vld [vmem:[%s1552_s5 + $0x28] sm:$0xff]  ;;  %v430_v19 = vrot.slane %v1596_v8, 1  ;;  %v681_v42 = vrot.slane %v1608_v11, 1 }
  0x26   : > { %v304_v3 = vmul.u32 128, %v1568_v1  ;;  %s1588_s6 = scalar_lea.vmem %s1883_s2, %s1172_s24  ;;  %v1617_v13 = vld [vmem:[%s1558_s26 + $0x18] sm:$0xff]  ;;  %v1625_v15 = vld [vmem:[%s1558_s26 + $0x20] sm:$0xff]  ;;  %v1634_v18 = vadd.s32 8, %v1568_v1  ;;  %vm431_vm0 = vcmp.lt.s32.totalorder %v1568_v1, 7  ;;  %v675_v44 = vrot.slane %v1611_v12, 1 }
  0x27   : > { %v1337_v20 = vld [vmem:[%s1588_s6] ss:$0 sm:$0xff]  ;;  %v433_v23 = vsel %vm431_vm0, %v430_v19, %v429_v17  ;;  %v1336_v24 = vld [vmem:[%s1588_s6 + $0x3] ss:$0 sm:$0xff]  ;;  %v432_v26 = vsel %vm431_vm0, %v429_v17, %v430_v19  ;;  %v440_v27 = vsel %vm431_vm0, %v438_v22, %v437_v21  ;;  %v439_v30 = vsel %vm431_vm0, %v437_v21, %v438_v22  ;;  %v1338_v45 = vld [vmem:[%s1588_s6 + $0x4] ss:$0 sm:$0xff] }
  0x28   : > { %v1575_v4 = vadd.s32 %v304_v3, %v1571_v2  ;;  %vm303_vm1 = vcmp.eq.s32.totalorder %v1634_v18, 15  ;;  %v444_v29 = vsub.f32 %v1581_v6, %v432_v26  ;;  %v448_v35 = vsub.f32 %v1578_v5, %v439_v30  ;;  %v1341_v58 = vld [vmem:[%s1588_s6 + $0x1] ss:$0 sm:$0xff] }
  0x29   : > { %v436_v25 = vsel %vm303_vm1, %v1337_v20, %v433_v23  ;;  %v443_v31 = vsel %vm303_vm1, %v1336_v24, %v440_v27  ;;  %v682_v43 = vrot.slane %v1617_v13, 1  ;;  %v674_v46 = vrot.slane %v1599_v9, 1 }
  0x2a   : > { %v445_v28 = vsub.f32 %v1596_v8, %v436_v25  ;;  %v449_v32 = vsub.f32 %v1593_v7, %v443_v31  ;;  %v446_v34 = vand.u32 2147483647, %v444_v29  ;;  %v450_v38 = vand.u32 2147483647, %v448_v35 }
  0x2b   : > { %318 = vrot.lane.b32.xlu1 %v1593_v7, %s1460_s7  ;;  %v684_v49 = vsel %vm431_vm0, %v682_v43, %v681_v42  ;;  %v676_v52 = vsel %vm431_vm0, %v674_v46, %v675_v44  ;;  %v677_v55 = vsel %vm431_vm0, %v675_v44, %v674_v46  ;;  %v683_v3 = vsel %vm431_vm0, %v681_v42, %v682_v43 }
  0x2c   : > { %312 = vrot.lane.b32.xlu0 %v1596_v8, %s1460_s7  ;;  %807 = vrot.lane.b32.xlu2 %v1605_v10, %s1460_s7  ;;  %v447_v33 = vand.u32 2147483647, %v445_v28  ;;  %v451_v36 = vand.u32 2147483647, %v449_v32  ;;  %v484_v39 = vmul.f32 %v450_v38, %v450_v38  ;;  %v472_v47 = vmul.f32 %v446_v34, %v446_v34 }
  0x2d   : > { %v687_v51 = vsel %vm303_vm1, %v1338_v45, %v684_v49  ;;  %v688_v57 = vsub.f32 %v1599_v9, %v676_v52  ;;  %v496_v59 = vmul.f32 %v450_v38, %v446_v34  ;;  %v680_v61 = vsel %vm303_vm1, %v1341_v58, %v677_v55 }
  0x2e   : > { %v452_v37 = vadd.f32 %v447_v33, %v446_v34  ;;  %v485_v40 = vmul.f32 %v451_v36, %v451_v36  ;;  %v473_v48 = vmul.f32 %v447_v33, %v447_v33  ;;  %v518_v50 = vmin.f32 %v450_v38, %v451_v36 }
  0x2f   : > { %v462_v54 = vadd.f32 %v451_v36, %v450_v38  ;;  %v693_v56 = vsub.f32 %v1617_v13, %v687_v51  ;;  %v497_v60 = vmul.f32 %v451_v36, %v447_v33  ;;  %v689_v62 = vsub.f32 %v1611_v12, %v680_v61 }
  0x30   : > { %v486_v41 = vadd.f32 %v485_v40, %v484_v39  ;;  %v474_v53 = vadd.f32 %v473_v48, %v472_v47  ;;  %v1680_v0 = vand.u32 2147483647, %v688_v57  ;;  %v508_v17 = vmin.f32 %v446_v34, %v447_v33 }
  0x31   : > { %v1678_v63 = vand.u32 2147483647, %v693_v56  ;;  %v498_v19 = vadd.f32 %v497_v60, %v496_v59  ;;  %v1684_v20 = vand.u32 2147483647, %v689_v62  ;;  %v692_v21 = vsub.f32 %v1608_v11, %v683_v3 }
  0x32   : > { %v716_v24 = vmul.f32 %v1680_v0, %v1680_v0  ;;  %vm297_vm2 = vcmp.lt.s32.totalorder %v1571_v2, 127  ;;  %v919_v2 = vrot.slane %v1628_v16, 1  ;;  %vm406_vm3 = vcmp.eq.s32.totalorder %v1575_v4, 0 }
  0x33   : > { %561 = vrot.lane.b32.xlu1 %v1608_v11, %s1460_s7  ;;  %v1687_v22 = vand.u32 2147483647, %v692_v21  ;;  %v717_v25 = vmul.f32 %v1684_v20, %v1684_v20  ;;  %v696_v26 = vadd.f32 %v1684_v20, %v1680_v0  ;;  %v729_v29 = vmul.f32 %v1678_v63, %v1678_v63 }
  0x34   : > { %557 = vrot.lane.b32.xlu0 %v1611_v12, %s1460_s7  ;;  %v741_v59 = vmul.f32 %v1678_v63, %v1684_v20  ;;  %vm409_vm4 = vcmp.eq.s32.totalorder %v1575_v4, 1  ;;  %vm412_vm5 = vcmp.eq.s32.totalorder %v1575_v4, 2  ;;  %vm415_vm6 = vcmp.eq.s32.totalorder %v1575_v4, 3 }
  0x35   : > { %v706_v23 = vadd.f32 %v1678_v63, %v1687_v22  ;;  %v718_v27 = vadd.f32 %v717_v25, %v716_v24  ;;  %v728_v28 = vmul.f32 %v1687_v22, %v1687_v22  ;;  %v740_v58 = vmul.f32 %v1687_v22, %v1680_v0 }
  0x36   : > { %vm418_vm7 = vcmp.eq.s32.totalorder %v1575_v4, 4  ;;  %vm421_vm8 = vcmp.eq.s32.totalorder %v1575_v4, 5  ;;  %vm424_vm9 = vcmp.eq.s32.totalorder %v1575_v4, 6  ;;  %vm528_vm10 = vcmp.eq.s32.totalorder %v1575_v4, 384 }
  0x37   : > { %v730_v30 = vadd.f32 %v729_v29, %v728_v28  ;;  %v742_v3 = vadd.f32 %v741_v59, %v740_v58  ;;  %vm531_vm11 = vcmp.eq.s32.totalorder %v1575_v4, 385  ;;  %vm534_vm12 = vcmp.eq.s32.totalorder %v1575_v4, 386 }
  0x38   : > { %vm537_vm13 = vcmp.eq.s32.totalorder %v1575_v4, 387  ;;  %vm540_vm14 = vcmp.eq.s32.totalorder %v1575_v4, 388  ;;  %vm543_vm15 = vcmp.eq.s32.totalorder %v1575_v4, 389 }
  0x3b   : > { %799 = vrot.lane.b32.xlu1 %v1620_v14, %s1460_s7 }
  0x3c   : > { %563 = vrot.lane.b32.xlu0 %v1617_v13, %s1460_s7 }
  0x43   : > { %805 = vrot.lane.b32.xlu1 %v1625_v15, %s1460_s7 }
  0x44   : > { %801 = vrot.lane.b32.xlu0 %v1628_v16, %s1460_s7 }
  0x55   : > { %453 = vadd.xlane.f32.xlu2 %v452_v37 }
  0x5d   : > { %487 = vadd.xlane.f32.xlu2 %v486_v41 }
  0x65   : > { %519 = vmin.xlane.f32.xlu2 %v518_v50 }
  0x6d   : > { %475 = vadd.xlane.f32.xlu1 %v474_v53  ;;  %707 = vadd.xlane.f32.xlu2 %v706_v23 }
  0x6e   : > { %463 = vadd.xlane.f32.xlu0 %v462_v54  ;;  %v752_v54 = vmin.f32 %v1680_v0, %v1684_v20 }
  0x75   : > { %509 = vmin.xlane.f32.xlu1 %v508_v17 }
  0x76   : > { %499 = vadd.xlane.f32.xlu0 %v498_v19 }
  0x7d   : > { %697 = vadd.xlane.f32.xlu1 %v696_v26 }
  0x7e   : > { %719 = vadd.xlane.f32.xlu0 %v718_v27  ;;  %v556_v36 = vpop.permute.xlu2 %555 }
  0x7f   : > { %v559_v45 = vsel %vm297_vm2, %v556_v36, 0.0 }
  0x85   : > { %731 = vadd.xlane.f32.xlu1 %v730_v30 }
  0x95   : > { %v317_v31 = vpop.permute.xlu1 %316 }
  0x96   : > { %v311_v32 = vpop.permute.xlu0 %310  ;;  %v320_v33 = vsel %vm297_vm2, %v317_v31, 0.0 }
  0x97   : > { %v314_v34 = vsel %vm297_vm2, %v311_v32, 0.0  ;;  %v326_v35 = vsub.f32 %v1578_v5, %v320_v33 }
  0x98   : > { %v322_v37 = vsub.f32 %v1581_v6, %v314_v34  ;;  %v567_v6 = vsub.f32 %v1599_v9, %v559_v45 }
  0x99   : > { %v328_v44 = vand.u32 2147483647, %v326_v35 }
  0x9a   : > { %v324_v5 = vand.u32 2147483647, %v322_v37 }
  0x9b   : > { %v362_v23 = vmul.f32 %v328_v44, %v328_v44 }
  0x9c   : > { %v374_v27 = vmul.f32 %v328_v44, %v324_v5 }
  0x9d   : > { %v319_v38 = vpop.permute.xlu1 %318 }
  0x9e   : > { %v313_v39 = vpop.permute.xlu0 %312  ;;  %v321_v40 = vsel %vm297_vm2, %v319_v38, 0.0 }
  0x9f   : > { %v315_v41 = vsel %vm297_vm2, %v313_v39, 0.0  ;;  %v327_v42 = vsub.f32 %v1593_v7, %v321_v40  ;;  %v808_v40 = vpop.permute.xlu2 %807 }
  0xa0   : > { %v323_v43 = vsub.f32 %v1596_v8, %v315_v41  ;;  %v569_v8 = vand.u32 2147483647, %v567_v6 }
  0xa1   : > { %v329_v46 = vand.u32 2147483647, %v327_v42 }
  0xa2   : > { %v325_v47 = vand.u32 2147483647, %v323_v43  ;;  %v595_v33 = vmul.f32 %v569_v8, %v569_v8 }
  0xa3   : > { %v340_v48 = vadd.f32 %v329_v46, %v328_v44  ;;  %v396_v49 = vmin.f32 %v328_v44, %v329_v46  ;;  %v363_v19 = vmul.f32 %v329_v46, %v329_v46  ;;  %v810_v44 = vsel %vm297_vm2, %v808_v40, 0.0 }
  0xa4   : > { %v330_v50 = vadd.f32 %v325_v47, %v324_v5  ;;  %v386_v56 = vmin.f32 %v324_v5, %v325_v47  ;;  %v375_v26 = vmul.f32 %v329_v46, %v325_v47 }
  0xa5   : > { %341 = vadd.xlane.f32.xlu0 %v340_v48  ;;  %397 = vmin.xlane.f32.xlu1 %v396_v49  ;;  %v562_v52 = vpop.permute.xlu1 %561  ;;  %v364_v25 = vadd.f32 %v363_v19, %v362_v23 }
  0xa6   : > { %v558_v51 = vpop.permute.xlu0 %557  ;;  %331 = vadd.xlane.f32.xlu2 %v330_v50  ;;  %v565_v9 = vsel %vm297_vm2, %v562_v52, 0.0  ;;  %v376_v30 = vadd.f32 %v375_v26, %v374_v27  ;;  %v918_v50 = vrot.slane %v1620_v14, 1 }
  0xa7   : > { %v560_v7 = vsel %vm297_vm2, %v558_v51, 0.0  ;;  %v571_v60 = vsub.f32 %v1608_v11, %v565_v9  ;;  %v351_v11 = vmul.f32 %v325_v47, %v325_v47  ;;  %v816_v47 = vsub.f32 %v1605_v10, %v810_v44  ;;  %v1339_v9 = vld [vmem:[%s1588_s6 + $0x2] ss:$0 sm:$0xff] }
  0xa8   : > { %v568_v53 = vsub.f32 %v1611_v12, %v560_v7  ;;  %v762_v12 = vmin.f32 %v1687_v22, %v1678_v63  ;;  %v350_v22 = vmul.f32 %v324_v5, %v324_v5  ;;  %v925_v51 = vrot.slane %v1625_v15, 1 }
  0xa9   : > { %v573_v21 = vand.u32 2147483647, %v571_v60  ;;  %v926_v7 = vrot.slane %v1605_v10, 1 }
  0xaa   : > { %v570_v55 = vand.u32 2147483647, %v568_v53  ;;  %v352_v29 = vadd.f32 %v351_v11, %v350_v22 }
  0xab   : > { %v619_v35 = vmul.f32 %v573_v21, %v569_v8 }
  0xac   : > { %v631_v57 = vmin.f32 %v569_v8, %v570_v55  ;;  %v575_v24 = vadd.f32 %v570_v55, %v569_v8  ;;  %v596_v34 = vmul.f32 %v570_v55, %v570_v55  ;;  %v818_v8 = vand.u32 2147483647, %v816_v47 }
  0xad   : > { %387 = vmin.xlane.f32.xlu0 %v386_v56  ;;  %v800_v28 = vpop.permute.xlu1 %799  ;;  %v921_v56 = vsel %vm431_vm0, %v919_v2, %v918_v50 }
  0xae   : > { %v564_v61 = vpop.permute.xlu0 %563  ;;  %632 = vmin.xlane.f32.xlu2 %v631_v57  ;;  %v597_v39 = vadd.f32 %v596_v34, %v595_v33  ;;  %v803_v42 = vsel %vm297_vm2, %v800_v28, 0.0  ;;  %v1340_v57 = vld [vmem:[%s1588_s6 + $0x5] ss:$0 sm:$0xff]  ;;  %v852_v23 = vmul.f32 %v818_v8, %v818_v8 }
  0xaf   : > { %v566_v62 = vsel %vm297_vm2, %v564_v61, 0.0  ;;  %v811_v5 = vsub.f32 %v1620_v14, %v803_v42  ;;  %v924_v61 = vsel %vm303_vm1, %v1339_v9, %v921_v56 }
  0xb0   : > { %v572_v17 = vsub.f32 %v1617_v13, %v566_v62  ;;  %v607_v13 = vmul.f32 %v573_v21, %v573_v21  ;;  %v920_v62 = vsel %vm431_vm0, %v918_v50, %v919_v2 }
  0xb1   : > { %v813_v48 = vand.u32 2147483647, %v811_v5 }
  0xb2   : > { %v574_v0 = vand.u32 2147483647, %v572_v17 }
  0xb3   : > { %v839_v53 = vmul.f32 %v813_v48, %v813_v48 }
  0xb4   : > { %v585_v20 = vadd.f32 %v574_v0, %v573_v21  ;;  %v641_v63 = vmin.f32 %v573_v21, %v574_v0  ;;  %v608_v31 = vmul.f32 %v574_v0, %v574_v0  ;;  %v620_v32 = vmul.f32 %v574_v0, %v570_v55 }
  0xb5   : > { %576 = vadd.xlane.f32.xlu0 %v575_v24  ;;  %v806_v41 = vpop.permute.xlu1 %805  ;;  %v933_v21 = vsub.f32 %v1628_v16, %v924_v61 }
  0xb6   : > { %586 = vadd.xlane.f32.xlu1 %v585_v20  ;;  %365 = vadd.xlane.f32.xlu2 %v364_v25  ;;  %v802_v36 = vpop.permute.xlu0 %801  ;;  %v609_v37 = vadd.f32 %v608_v31, %v607_v13  ;;  %v621_v38 = vadd.f32 %v620_v32, %v619_v35  ;;  %v809_v45 = vsel %vm297_vm2, %v806_v41, 0.0  ;;  %v932_v20 = vsub.f32 %v1620_v14, %v920_v62 }
  0xb7   : > { %v804_v43 = vsel %vm297_vm2, %v802_v36, 0.0  ;;  %v815_v6 = vsub.f32 %v1625_v15, %v809_v45  ;;  %v935_v26 = vand.u32 2147483647, %v933_v21  ;;  %vm654_vm2 = vcmp.eq.s32.totalorder %v1575_v4, 129 }
  0xb8   : > { %v812_v46 = vsub.f32 %v1628_v16, %v804_v43  ;;  %v934_v1 = vand.u32 2147483647, %v932_v20 }
  0xb9   : > { %v817_v52 = vand.u32 2147483647, %v815_v6  ;;  %v961_v31 = vmul.f32 %v935_v26, %v935_v26 }
  0xba   : > { %v814_v49 = vand.u32 2147483647, %v812_v46  ;;  %v940_v28 = vadd.f32 %v935_v26, %v934_v1  ;;  %v996_v36 = vmin.f32 %v934_v1, %v935_v26 }
  0xbb   : > { %v829_v58 = vadd.f32 %v818_v8, %v817_v52  ;;  %v863_v17 = vmul.f32 %v817_v52, %v813_v48  ;;  %v851_v0 = vmul.f32 %v817_v52, %v817_v52 }
  0xbc   : > { %v840_v55 = vmul.f32 %v814_v49, %v814_v49  ;;  %v819_v60 = vadd.f32 %v814_v49, %v813_v48  ;;  %v864_v19 = vmul.f32 %v818_v8, %v814_v49  ;;  %v875_v11 = vmin.f32 %v813_v48, %v814_v49 }
  0xbd   : > { %642 = vmin.xlane.f32.xlu0 %v641_v63  ;;  %v853_v63 = vadd.f32 %v852_v23, %v851_v0 }
  0xbe   : > { %353 = vadd.xlane.f32.xlu1 %v352_v29  ;;  %377 = vadd.xlane.f32.xlu2 %v376_v30  ;;  %v841_v59 = vadd.f32 %v840_v55, %v839_v53  ;;  %v865_v25 = vadd.f32 %v864_v19, %v863_v17  ;;  %v885_v29 = vmin.f32 %v817_v52, %v818_v8 }
  0xc5   : > { %610 = vadd.xlane.f32.xlu0 %v609_v37 }
  0xc6   : > { %622 = vadd.xlane.f32.xlu1 %v621_v38  ;;  %598 = vadd.xlane.f32.xlu2 %v597_v39 }
  0xc8   : > { %v454_v37 = vpop.xlane.xlu2 %453 }
  0xc9   : > { %v455_v50 = vrot.slane %v454_v37, 4 }
  0xcb   : > { %v456_v55 = vadd.f32 %v455_v50, %v454_v37 }
  0xcd   : > { %753 = vmin.xlane.f32.xlu0 %v752_v54  ;;  %v928_v54 = vsel %vm431_vm0, %v926_v7, %v925_v51 }
  0xce   : > { %763 = vmin.xlane.f32.xlu1 %v762_v12  ;;  %743 = vadd.xlane.f32.xlu2 %v742_v3  ;;  %v931_v12 = vsel %vm303_vm1, %v1340_v57, %v928_v54  ;;  %v927_v3 = vsel %vm431_vm0, %v925_v51, %v926_v7  ;;  %vm546_vm0 = vcmp.eq.s32.totalorder %v1575_v4, 390  ;;  %vm651_vm1 = vcmp.eq.s32.totalorder %v1575_v4, 128 }
  0xcf   : > { %v937_v24 = vsub.f32 %v1605_v10, %v931_v12  ;;  %v936_v18 = vsub.f32 %v1625_v15, %v927_v3  ;;  %v960_v15 = vmul.f32 %v934_v1, %v934_v1  ;;  %v457_v3 = vrot.slane %v456_v55, 2 }
  0xd0   : > { %v488_v40 = vpop.xlane.xlu2 %487 }
  0xd1   : > { %v939_v22 = vand.u32 2147483647, %v937_v24  ;;  %v938_v27 = vand.u32 2147483647, %v936_v18  ;;  %v962_v34 = vadd.f32 %v961_v31, %v960_v15  ;;  %v489_v8 = vrot.slane %v488_v40, 4 }
  0xd2   : > { %v458_v18 = vadd.f32 %v457_v3, %v456_v55 }
  0xd3   : > { %v950_v16 = vadd.f32 %v939_v22, %v938_v27  ;;  %v972_v30 = vmul.f32 %v938_v27, %v938_v27  ;;  %v973_v10 = vmul.f32 %v939_v22, %v939_v22  ;;  %v984_v14 = vmul.f32 %v938_v27, %v934_v1 }
  0xd4   : > { %v985_v13 = vmul.f32 %v939_v22, %v935_v26  ;;  %v1006_v35 = vmin.f32 %v938_v27, %v939_v22 }
  0xd5   : > { %830 = vadd.xlane.f32.xlu0 %v829_v58  ;;  %v974_v32 = vadd.f32 %v973_v10, %v972_v30 }
  0xd6   : > { %842 = vadd.xlane.f32.xlu1 %v841_v59  ;;  %820 = vadd.xlane.f32.xlu2 %v819_v60  ;;  %v986_v33 = vadd.f32 %v985_v13, %v984_v14  ;;  %v490_v60 = vadd.f32 %v489_v8, %v488_v40  ;;  %v459_v14 = vrot.slane %v458_v18, 1 }
  0xd8   : > { %v520_v43 = vpop.xlane.xlu2 %519  ;;  %v491_v23 = vrot.slane %v490_v60, 2  ;;  %v1779_v40 = vadd.f32 %v459_v14, %v458_v18 }
  0xdd   : > { %866 = vadd.xlane.f32.xlu0 %v865_v25  ;;  %v521_v25 = vrot.slane %v520_v43, 4 }
  0xde   : > { %876 = vmin.xlane.f32.xlu1 %v875_v11  ;;  %854 = vadd.xlane.f32.xlu2 %v853_v63 }
  0xdf   : > { %v522_v15 = vmin.f32 %v520_v43, %v521_v25 }
  0xe0   : > { %v476_v38 = vpop.xlane.xlu1 %475  ;;  %v708_v5 = vpop.xlane.xlu2 %707 }
  0xe1   : > { %v464_v39 = vpop.xlane.xlu0 %463  ;;  %v477_v9 = vrot.slane %v476_v38, 4  ;;  %v709_v10 = vrot.slane %v708_v5, 4 }
  0xe2   : > { %v465_v2 = vrot.slane %v464_v39, 4 }
  0xe3   : > { %v478_v17 = vadd.f32 %v477_v9, %v476_v38 }
  0xe4   : > { %v466_v57 = vadd.f32 %v465_v2, %v464_v39  ;;  %v1777_v39 = vadd.f32 %v709_v10, %v708_v5 }
  0xe5   : > { %941 = vadd.xlane.f32.xlu0 %v940_v28  ;;  %v479_v20 = vrot.slane %v478_v17, 2  ;;  %v492_v28 = vadd.f32 %v491_v23, %v490_v60 }
  0xe6   : > { %951 = vadd.xlane.f32.xlu1 %v950_v16  ;;  %886 = vmin.xlane.f32.xlu2 %v885_v29  ;;  %v467_v21 = vrot.slane %v466_v57, 2  ;;  %v711_v9 = vrot.slane %v1777_v39, 2 }
  0xe7   : > { %v480_v13 = vadd.f32 %v479_v20, %v478_v17 }
  0xe8   : > { %v510_v41 = vpop.xlane.xlu1 %509  ;;  %v468_v22 = vadd.f32 %v467_v21, %v466_v57 }
  0xe9   : > { %v500_v42 = vpop.xlane.xlu0 %499  ;;  %v511_v16 = vrot.slane %v510_v41, 4 }
  0xea   : > { %v501_v24 = vrot.slane %v500_v42, 4 }
  0xec   : > { %v502_v1 = vadd.f32 %v501_v24, %v500_v42  ;;  %v481_v42 = vrot.slane %v480_v13, 1 }
  0xed   : > { %975 = vadd.xlane.f32.xlu0 %v974_v32 }
  0xee   : > { %987 = vadd.xlane.f32.xlu1 %v986_v33  ;;  %963 = vadd.xlane.f32.xlu2 %v962_v34  ;;  %v469_v33 = vrot.slane %v468_v22, 1  ;;  %v503_v34 = vrot.slane %v502_v1, 2 }
  0xf0   : > { %v1768_v44 = vpop.xlane.xlu1 %697  ;;  %v1781_v43 = vadd.f32 %v469_v33, %v468_v22  ;;  %v504_v8 = vadd.f32 %v503_v34, %v502_v1 }
  0xf1   : > { %v1770_v45 = vpop.xlane.xlu0 %719  ;;  %v699_v37 = vrot.slane %v1768_v44, 4 }
  0xf2   : > { %v505_v17 = vrot.slane %v504_v8, 1 }
  0xf3   : > { %v1787_v5 = vadd.f32 %v699_v37, %v1768_v44 }
  0xf5   : > { %1007 = vmin.xlane.f32.xlu0 %v1006_v35  ;;  %v493_v35 = vrot.slane %v492_v28, 1  ;;  %v701_v44 = vrot.slane %v1787_v5, 2 }
  0xf6   : > { %997 = vmin.xlane.f32.xlu2 %v996_v36  ;;  %v512_v36 = vmin.f32 %v510_v41, %v511_v16 }
  0xf7   : > { %v1784_v41 = vadd.f32 %v493_v35, %v492_v28 }
  0xf8   : > { %v1772_v46 = vpop.xlane.xlu1 %731 }
  0xf9   : > { %v733_v24 = vrot.slane %v1772_v46, 4 }
 0x118   : > { %v342_v47 = vpop.xlane.xlu0 %341  ;;  %v398_v54 = vpop.xlane.xlu1 %397 }
 0x119   : > { %v343_v6 = vrot.slane %v342_v47, 4  ;;  %v332_v48 = vpop.xlane.xlu2 %331  ;;  %v399_v11 = vrot.slane %v398_v54, 4 }
 0x11a   : > { %v333_v49 = vrot.slane %v332_v48, 4 }
 0x11b   : > { %v344_v51 = vadd.f32 %v343_v6, %v342_v47  ;;  %v400_v31 = vmin.f32 %v398_v54, %v399_v11  ;;  %v523_v47 = vrot.slane %v522_v15, 2  ;;  %v1790_v54 = vadd.f32 %v481_v42, %v480_v13 }
 0x11c   : > { %v334_v7 = vadd.f32 %v333_v49, %v332_v48 }
 0x11d   : > { %v345_v52 = vrot.slane %v344_v51, 2  ;;  %v401_v6 = vrot.slane %v400_v31, 2 }
 0x11e   : > { %v335_v53 = vrot.slane %v334_v7, 2 }
 0x11f   : > { %v346_v56 = vadd.f32 %v345_v52, %v344_v51  ;;  %v721_v51 = vrot.slane %v1770_v45, 4  ;;  %v513_v52 = vrot.slane %v512_v36, 2 }
 0x120   : > { %v388_v58 = vpop.xlane.xlu0 %387  ;;  %v336_v59 = vadd.f32 %v335_v53, %v334_v7 }
 0x121   : > { %v1774_v61 = vpop.xlane.xlu2 %632  ;;  %v347_v12 = vrot.slane %v346_v56, 1  ;;  %v389_v29 = vrot.slane %v388_v58, 4  ;;  %v1798_v25 = vmin.f32 %v512_v36, %v513_v52 }
 0x122   : > { %v337_v62 = vrot.slane %v336_v59, 1  ;;  %v634_v21 = vrot.slane %v1774_v61, 4 }
 0x123   : > { %v348_v19 = vadd.f32 %v347_v12, %v346_v56  ;;  %v390_v38 = vmin.f32 %v388_v58, %v389_v29  ;;  %v402_v12 = vmin.f32 %v400_v31, %v401_v6 }
 0x124   : > { %v338_v0 = vadd.f32 %v337_v62, %v336_v59  ;;  %v1793_v62 = vadd.f32 %v721_v51, %v1770_v45  ;;  %v635_v13 = vmin.f32 %v1774_v61, %v634_v21 }
 0x125   : > { %v391_v53 = vrot.slane %v390_v38, 2  ;;  %v403_v28 = vrot.slane %v402_v12, 1 }
 0x126   : > { %1189 = vpush %v338_v0  ;;  %v636_v51 = vrot.slane %v635_v13, 2 }
 0x127   : > { %1191 = vpush %v348_v19  ;;  %v524_v19 = vmin.f32 %v522_v15, %v523_v47  ;;  %v392_v23 = vmin.f32 %v390_v38, %v391_v53  ;;  %v404_v52 = vmin.f32 %v402_v12, %v403_v28  ;;  %v506_v53 = vadd.f32 %v505_v17, %v504_v8 }
 0x128   : > { %v577_v26 = vpop.xlane.xlu0 %576  ;;  %v637_v17 = vmin.f32 %v635_v13, %v636_v51 }
 0x129   : > { %v587_v63 = vpop.xlane.xlu1 %586  ;;  %v366_v27 = vpop.xlane.xlu2 %365  ;;  %v578_v56 = vrot.slane %v577_v26, 4 }
 0x12a   : > { %v367_v30 = vrot.slane %v366_v27, 4  ;;  %v588_v58 = vrot.slane %v587_v63, 4 }
 0x12b   : > { %v579_v20 = vadd.f32 %v578_v56, %v577_v26  ;;  %v515_v56 = vrot.slane %v1798_v25, 1 }
 0x12c   : > { %v368_v32 = vadd.f32 %v367_v30, %v366_v27  ;;  %v589_v11 = vadd.f32 %v588_v58, %v587_v63 }
 0x12d   : > { %v580_v26 = vrot.slane %v579_v20, 2 }
 0x12e   : > { %v369_v48 = vrot.slane %v368_v32, 2  ;;  %v590_v63 = vrot.slane %v589_v11, 2 }
 0x130   : > { %v643_v49 = vpop.xlane.xlu0 %642  ;;  %v370_v60 = vadd.f32 %v369_v48, %v368_v32  ;;  %v393_v32 = vrot.slane %v392_v23, 1  ;;  %v525_v48 = vrot.slane %v524_v19, 1 }
 0x131   : > { %v354_v50 = vpop.xlane.xlu1 %353  ;;  %v378_v7 = vpop.xlane.xlu2 %377  ;;  %v644_v16 = vrot.slane %v643_v49, 4 }
 0x132   : > { %v355_v2 = vrot.slane %v354_v50, 4  ;;  %v379_v55 = vrot.slane %v378_v7, 4  ;;  %v371_v45 = vrot.slane %v370_v60, 1  ;;  %v526_v12 = vmin.f32 %v524_v19, %v525_v48 }
 0x133   : > { %v645_v42 = vmin.f32 %v643_v49, %v644_v16  ;;  %v591_v49 = vadd.f32 %v590_v63, %v589_v11 }
 0x134   : > { %v356_v57 = vadd.f32 %v355_v2, %v354_v50  ;;  %v380_v59 = vadd.f32 %v379_v55, %v378_v7  ;;  %v372_v37 = vadd.f32 %v371_v45, %v370_v60  ;;  %v734_v50 = vadd.f32 %v733_v24, %v1772_v46 }
 0x135   : > { %v394_v2 = vmin.f32 %v392_v23, %v393_v32  ;;  %v723_v7 = vrot.slane %v1793_v62, 2  ;;  %v581_v55 = vadd.f32 %v580_v26, %v579_v20  ;;  %v592_v45 = vrot.slane %v591_v49, 1 }
 0x136   : > { %v357_v3 = vrot.slane %v356_v57, 2  ;;  %v381_v0 = vrot.slane %v380_v59, 2  ;;  %v735_v24 = vrot.slane %v734_v50, 2 }
 0x137   : > { %v582_v20 = vrot.slane %v581_v55, 1 }
 0x138   : > { %v358_v18 = vadd.f32 %v357_v3, %v356_v57  ;;  %v611_v22 = vpop.xlane.xlu0 %610  ;;  %v382_v27 = vadd.f32 %v381_v0, %v380_v59  ;;  %v646_v3 = vrot.slane %v645_v42, 2  ;;  %v736_v13 = vadd.f32 %v735_v24, %v734_v50 }
 0x139   : > { %v623_v1 = vpop.xlane.xlu1 %622  ;;  %v612_v29 = vrot.slane %v611_v22, 4  ;;  %v599_v10 = vpop.xlane.xlu2 %598 }
 0x13a   : > { %v624_v30 = vrot.slane %v623_v1, 4  ;;  %v359_v14 = vrot.slane %v358_v18, 1  ;;  %v600_v15 = vrot.slane %v599_v10, 4  ;;  %v383_v31 = vrot.slane %v382_v27, 1 }
 0x13b   : > { %v613_v33 = vadd.f32 %v612_v29, %v611_v22  ;;  %v647_v19 = vmin.f32 %v645_v42, %v646_v3  ;;  %v737_v42 = vrot.slane %v736_v13, 1 }
 0x13c   : > { %v625_v34 = vadd.f32 %v624_v30, %v623_v1  ;;  %v360_v35 = vadd.f32 %v359_v14, %v358_v18  ;;  %v601_v36 = vadd.f32 %v600_v15, %v599_v10  ;;  %v384_v38 = vadd.f32 %v383_v31, %v382_v27 }
 0x13d   : > { %v614_v47 = vrot.slane %v613_v33, 2  ;;  %v516_v1 = vmin.f32 %v1798_v25, %v515_v56  ;;  %v724_v25 = vadd.f32 %v723_v7, %v1793_v62  ;;  %v583_v10 = vadd.f32 %v582_v20, %v581_v55 }
 0x13e   : > { %v626_v6 = vrot.slane %v625_v34, 2  ;;  %1193 = vpush %v360_v35  ;;  %v602_v61 = vrot.slane %v601_v36, 2  ;;  %v593_v15 = vadd.f32 %v592_v45, %v591_v49 }
 0x13f   : > { %1195 = vpush %v372_v37  ;;  %v615_v60 = vadd.f32 %v614_v47, %v613_v33 }
 0x140   : > { %1197 = vpush %v384_v38  ;;  %v754_v57 = vpop.xlane.xlu0 %753  ;;  %v603_v59 = vadd.f32 %v602_v61, %v601_v36  ;;  %v627_v23 = vadd.f32 %v626_v6, %v625_v34  ;;  %v648_v34 = vrot.slane %v647_v19, 1  ;;  %v725_v38 = vrot.slane %v724_v25, 1 }
 0x141   : > { %1199 = vpush %v394_v2  ;;  %v764_v58 = vpop.xlane.xlu1 %763  ;;  %v755_v46 = vrot.slane %v754_v57, 4  ;;  %v744_v0 = vpop.xlane.xlu2 %743  ;;  %v616_v28 = vrot.slane %v615_v60, 1 }
 0x142   : > { %1201 = vpush %v404_v52  ;;  %v765_v21 = vrot.slane %v764_v58, 4  ;;  %v745_v8 = vrot.slane %v744_v0, 4  ;;  %v604_v22 = vrot.slane %v603_v59, 1  ;;  %v649_v2 = vmin.f32 %v647_v19, %v648_v34 }
 0x143   : > { %1203 = vpush %v1779_v40  ;;  %v756_v18 = vmin.f32 %v754_v57, %v755_v46  ;;  %v628_v40 = vrot.slane %v627_v23, 1  ;;  %v617_v31 = vadd.f32 %v616_v28, %v615_v60  ;;  %v726_v57 = vadd.f32 %v725_v38, %v724_v25 }
 0x144   : > { %1205 = vpush %v1781_v43  ;;  %v766_v11 = vmin.f32 %v764_v58, %v765_v21  ;;  %v746_v27 = vadd.f32 %v745_v8, %v744_v0  ;;  %v712_v43 = vadd.f32 %v711_v9, %v1777_v39  ;;  %v605_v14 = vadd.f32 %v604_v22, %v603_v59 }
 0x145   : > { %1207 = vpush %v1790_v54  ;;  %v757_v16 = vrot.slane %v756_v18, 2  ;;  %v702_v54 = vadd.f32 %v701_v44, %v1787_v5  ;;  %v629_v33 = vadd.f32 %v628_v40, %v627_v23  ;;  %v738_v60 = vadd.f32 %v737_v42, %v736_v13 }
 0x146   : > { %1209 = vpush %v1784_v41  ;;  %v767_v29 = vrot.slane %v766_v11, 2  ;;  %v747_v30 = vrot.slane %v746_v27, 2  ;;  %v638_v41 = vrot.slane %v637_v17, 1  ;;  %v713_v44 = vrot.slane %v712_v43, 1 }
 0x147   : > { %1211 = vpush %v506_v53  ;;  %v758_v9 = vmin.f32 %v756_v18, %v757_v16  ;;  %v703_v62 = vrot.slane %v702_v54, 1 }
 0x148   : > { %1213 = vpush %v516_v1  ;;  %v831_v32 = vpop.xlane.xlu0 %830  ;;  %v748_v39 = vadd.f32 %v747_v30, %v746_v27  ;;  %v768_v37 = vmin.f32 %v766_v11, %v767_v29  ;;  %v639_v48 = vmin.f32 %v637_v17, %v638_v41  ;;  %v714_v49 = vadd.f32 %v713_v44, %v712_v43 }
 0x149   : > { %1215 = vpush %v526_v12  ;;  %v843_v26 = vpop.xlane.xlu1 %842  ;;  %v832_v35 = vrot.slane %v831_v32, 4  ;;  %v821_v5 = vpop.xlane.xlu2 %820  ;;  %v759_v61 = vrot.slane %v758_v9, 1  ;;  %v704_v53 = vadd.f32 %v703_v62, %v702_v54 }
 0x14a   : > { %1217 = vpush %v583_v10  ;;  %v844_v63 = vrot.slane %v843_v26, 4  ;;  %v822_v36 = vrot.slane %v821_v5, 4  ;;  %v749_v51 = vrot.slane %v748_v39, 1  ;;  %v769_v56 = vrot.slane %v768_v37, 1 }
 0x14b   : > { %1219 = vpush %v593_v15  ;;  %v833_v47 = vadd.f32 %v832_v35, %v831_v32  ;;  %v760_v46 = vmin.f32 %v758_v9, %v759_v61 }
 0x14c   : > { %1221 = vpush %v605_v14  ;;  %v845_v6 = vadd.f32 %v844_v63, %v843_v26  ;;  %v823_v50 = vadd.f32 %v822_v36, %v821_v5  ;;  %v750_v3 = vadd.f32 %v749_v51, %v748_v39  ;;  %v770_v18 = vmin.f32 %v768_v37, %v769_v56 }
 0x14d   : > { %1223 = vpush %v617_v31  ;;  %v834_v7 = vrot.slane %v833_v47, 2 }
 0x14e   : > { %1225 = vpush %v629_v33  ;;  %v846_v52 = vrot.slane %v845_v6, 2  ;;  %v824_v55 = vrot.slane %v823_v50, 2 }
 0x14f   : > { %1227 = vpush %v639_v48  ;;  %v835_v58 = vadd.f32 %v834_v7, %v833_v47 }
 0x150   : > { %1229 = vpush %v649_v2  ;;  %v847_v59 = vadd.f32 %v846_v52, %v845_v6  ;;  %v867_v21 = vpop.xlane.xlu0 %866  ;;  %v825_v23 = vadd.f32 %v824_v55, %v823_v50 }
 0x151   : > { %1231 = vpush %v704_v53  ;;  %v877_v0 = vpop.xlane.xlu1 %876  ;;  %v868_v24 = vrot.slane %v867_v21, 4  ;;  %v855_v8 = vpop.xlane.xlu2 %854  ;;  %v836_v17 = vrot.slane %v835_v58, 1 }
 0x152   : > { %1233 = vpush %v714_v49  ;;  %v878_v12 = vrot.slane %v877_v0, 4  ;;  %v848_v20 = vrot.slane %v847_v59, 1  ;;  %v856_v11 = vrot.slane %v855_v8, 4  ;;  %v826_v22 = vrot.slane %v825_v23, 1 }
 0x153   : > { %1235 = vpush %v726_v57  ;;  %v869_v1 = vadd.f32 %v868_v24, %v867_v21  ;;  %v837_v16 = vadd.f32 %v836_v17, %v835_v58 }
 0x154   : > { %1237 = vpush %v738_v60  ;;  %v879_v45 = vmin.f32 %v877_v0, %v878_v12  ;;  %v857_v27 = vadd.f32 %v856_v11, %v855_v8  ;;  %v827_v28 = vadd.f32 %v826_v22, %v825_v23  ;;  %v849_v43 = vadd.f32 %v848_v20, %v847_v59 }
 0x155   : > { %1239 = vpush %v750_v3  ;;  %v870_v40 = vrot.slane %v869_v1, 2 }
 0x156   : > { %1241 = vpush %v760_v46  ;;  %v880_v19 = vrot.slane %v879_v45, 2  ;;  %v858_v29 = vrot.slane %v857_v27, 2 }
 0x157   : > { %1243 = vpush %v770_v18  ;;  %v871_v30 = vadd.f32 %v870_v40, %v869_v1  ;;  %s1190_s8 = spop %1189 }
 0x158   : > { %1245 = vpush %v827_v28  ;;  %v881_v54 = vmin.f32 %v879_v45, %v880_v19  ;;  %v942_v25 = vpop.xlane.xlu0 %941  ;;  %v859_v14 = vadd.f32 %v858_v29, %v857_v27  ;;  %v407_v0 = vstv %s1190_s8  ;;  %s1192_s9 = spop %1191 }
 0x159   : > { %1247 = vpush %v837_v16  ;;  %v952_v10 = vpop.xlane.xlu1 %951  ;;  %v943_v41 = vrot.slane %v942_v25, 4  ;;  %v887_v13 = vpop.xlane.xlu2 %886  ;;  %v872_v26 = vrot.slane %v871_v30, 1  ;;  %v408_v22 = vsel %vm406_vm3, %v407_v0, 0.0  ;;  %v410_v27 = vstv %s1192_s9 }
 0x15a   : > { %1249 = vpush %v849_v43  ;;  %v953_v15 = vrot.slane %v952_v10, 4  ;;  %v888_v31 = vrot.slane %v887_v13, 4  ;;  %v860_v32 = vrot.slane %v859_v14, 1  ;;  %v882_v33 = vrot.slane %v881_v54, 1 }
 0x15b   : > { %v944_v39 = vadd.f32 %v943_v41, %v942_v25  ;;  %v873_v63 = vadd.f32 %v872_v26, %v871_v30  ;;  %v411_v29 = vsel %vm409_vm4, %v410_v27, %v408_v22  ;;  %vm657_vm3 = vcmp.eq.s32.totalorder %v1575_v4, 130 }
 0x15c   : > { %v954_v9 = vadd.f32 %v953_v15, %v952_v10  ;;  %v889_v34 = vmin.f32 %v887_v13, %v888_v31  ;;  %v861_v35 = vadd.f32 %v860_v32, %v859_v14  ;;  %v883_v44 = vmin.f32 %v881_v54, %v882_v33 }
 0x15d   : > { %v945_v5 = vrot.slane %v944_v39, 2  ;;  %vm660_vm4 = vcmp.eq.s32.totalorder %v1575_v4, 131 }
 0x15e   : > { %v955_v62 = vrot.slane %v954_v9, 2  ;;  %v890_v36 = vrot.slane %v889_v34, 2  ;;  %1251 = vpush %v861_v35 }
 0x15f   : > { %1253 = vpush %v873_v63  ;;  %v946_v37 = vadd.f32 %v945_v5, %v944_v39 }
 0x160   : > { %v956_v38 = vadd.f32 %v955_v62, %v954_v9  ;;  %1255 = vpush %v883_v44  ;;  %v976_v42 = vpop.xlane.xlu0 %975  ;;  %v891_v6 = vmin.f32 %v889_v34, %v890_v36 }
 0x161   : > { %v988_v47 = vpop.xlane.xlu1 %987  ;;  %v977_v48 = vrot.slane %v976_v42, 4  ;;  %v964_v50 = vpop.xlane.xlu2 %963  ;;  %v947_v61 = vrot.slane %v946_v37, 1 }
 0x162   : > { %v989_v51 = vrot.slane %v988_v47, 4  ;;  %v957_v2 = vrot.slane %v956_v38, 1  ;;  %v965_v7 = vrot.slane %v964_v50, 4  ;;  %v892_v52 = vrot.slane %v891_v6, 1 }
 0x163   : > { %v978_v53 = vadd.f32 %v977_v48, %v976_v42  ;;  %v948_v56 = vadd.f32 %v947_v61, %v946_v37 }
 0x164   : > { %v990_v55 = vadd.f32 %v989_v51, %v988_v47  ;;  %v966_v49 = vadd.f32 %v965_v7, %v964_v50  ;;  %v893_v57 = vmin.f32 %v891_v6, %v892_v52  ;;  %v958_v58 = vadd.f32 %v957_v2, %v956_v38 }
 0x165   : > { %v979_v59 = vrot.slane %v978_v53, 2 }
 0x166   : > { %v991_v60 = vrot.slane %v990_v55, 2  ;;  %v967_v3 = vrot.slane %v966_v49, 2  ;;  %1257 = vpush %v893_v57 }
 0x167   : > { %1259 = vpush %v948_v56  ;;  %v980_v21 = vadd.f32 %v979_v59, %v978_v53 }
 0x168   : > { %v992_v46 = vadd.f32 %v991_v60, %v990_v55  ;;  %1261 = vpush %v958_v58  ;;  %v1008_v23 = vpop.xlane.xlu0 %1007  ;;  %v968_v24 = vadd.f32 %v967_v3, %v966_v49 }
 0x169   : > { %v1009_v12 = vrot.slane %v1008_v23, 4  ;;  %v998_v8 = vpop.xlane.xlu2 %997  ;;  %v981_v17 = vrot.slane %v980_v21, 1 }
 0x16a   : > { %v993_v20 = vrot.slane %v992_v46, 1  ;;  %v999_v18 = vrot.slane %v998_v8, 4  ;;  %v969_v11 = vrot.slane %v968_v24, 1 }
 0x16b   : > { %v1010_v1 = vmin.f32 %v1008_v23, %v1009_v12  ;;  %v982_v45 = vadd.f32 %v981_v17, %v980_v21 }
 0x16c   : > { %v1000_v28 = vmin.f32 %v998_v8, %v999_v18  ;;  %v970_v16 = vadd.f32 %v969_v11, %v968_v24  ;;  %v994_v40 = vadd.f32 %v993_v20, %v992_v46 }
 0x16d   : > { %v1011_v19 = vrot.slane %v1010_v1, 2 }
 0x16e   : > { %v1001_v43 = vrot.slane %v1000_v28, 2  ;;  %1263 = vpush %v970_v16 }
 0x16f   : > { %s1194_s10 = spop %1193  ;;  %v1012_v30 = vmin.f32 %v1010_v1, %v1011_v19  ;;  %1265 = vpush %v982_v45 }
 0x170   : > { %v413_v54 = vstv %s1194_s10  ;;  %s1196_s11 = spop %1195  ;;  %v1002_v25 = vmin.f32 %v1000_v28, %v1001_v43  ;;  %1267 = vpush %v994_v40 }
 0x171   : > { %v414_v10 = vsel %vm412_vm5, %v413_v54, %v411_v29  ;;  %v416_v14 = vstv %s1196_s11  ;;  %s1198_s12 = spop %1197  ;;  %v1013_v15 = vrot.slane %v1012_v30, 1  ;;  %vm663_vm5 = vcmp.eq.s32.totalorder %v1575_v4, 132 }
 0x172   : > { %v417_v41 = vsel %vm415_vm6, %v416_v14, %v414_v10  ;;  %v419_v13 = vstv %s1198_s12  ;;  %s1200_s18 = spop %1199  ;;  %v1003_v26 = vrot.slane %v1002_v25, 1  ;;  %vm666_vm6 = vcmp.eq.s32.totalorder %v1575_v4, 133 }
 0x173   : > { %v420_v31 = vsel %vm418_vm7, %v419_v13, %v417_v41  ;;  %v422_v32 = vstv %s1200_s18  ;;  %s1202_s20 = spop %1201  ;;  %v1014_v33 = vmin.f32 %v1012_v30, %v1013_v15  ;;  %vm669_vm7 = vcmp.eq.s32.totalorder %v1575_v4, 134 }
 0x174   : > { %v423_v39 = vsel %vm421_vm8, %v422_v32, %v420_v31  ;;  %v425_v9 = vstv %s1202_s20  ;;  %s1204_s21 = spop %1203  ;;  %v1004_v63 = vmin.f32 %v1002_v25, %v1003_v26  ;;  %vm772_vm8 = vcmp.eq.s32.totalorder %v1575_v4, 512 }
 0x175   : > { %v426_v34 = vsel %vm424_vm9, %v425_v9, %v423_v39  ;;  %v529_v35 = vstv %s1204_s21  ;;  %s1206_s27 = spop %1205  ;;  %vm775_vm9 = vcmp.eq.s32.totalorder %v1575_v4, 513 }
 0x176   : > { %v530_v5 = vsel %vm528_vm10, %v529_v35, %v426_v34  ;;  %v532_v62 = vstv %s1206_s27  ;;  %s1208_s28 = spop %1207  ;;  %1269 = vpush %v1004_v63  ;;  %vm778_vm10 = vcmp.eq.s32.totalorder %v1575_v4, 514 }
 0x177   : > { %v533_v44 = vsel %vm531_vm11, %v532_v62, %v530_v5  ;;  %v535_v36 = vstv %s1208_s28  ;;  %s1210_s29 = spop %1209  ;;  %1271 = vpush %v1014_v33  ;;  %vm781_vm11 = vcmp.eq.s32.totalorder %v1575_v4, 515 }
 0x178   : > { %v536_v37 = vsel %vm534_vm12, %v535_v36, %v533_v44  ;;  %v538_v38 = vstv %s1210_s29  ;;  %s1212_s4 = spop %1211  ;;  %vm784_vm12 = vcmp.eq.s32.totalorder %v1575_v4, 516 }
 0x179   : > { %v539_v42 = vsel %vm537_vm13, %v538_v38, %v536_v37  ;;  %v541_v47 = vstv %s1212_s4  ;;  %s1214_s5 = spop %1213  ;;  %vm787_vm13 = vcmp.eq.s32.totalorder %v1575_v4, 517 }
 0x17a   : > { %v542_v6 = vsel %vm540_vm14, %v541_v47, %v539_v42  ;;  %v544_v48 = vstv %s1214_s5  ;;  %s1216_s25 = spop %1215  ;;  %vm790_vm14 = vcmp.eq.s32.totalorder %v1575_v4, 518 }
 0x17b   : > { %v545_v50 = vsel %vm543_vm15, %v544_v48, %v542_v6  ;;  %v547_v51 = vstv %s1216_s25  ;;  %s1218_s26 = spop %1217  ;;  %vm895_vm15 = vcmp.eq.s32.totalorder %v1575_v4, 256 }
 0x17c   : > { %v548_v61 = vsel %vm546_vm0, %v547_v51, %v545_v50  ;;  %v652_v2 = vstv %s1218_s26  ;;  %s1220_s22 = spop %1219  ;;  %vm898_vm0 = vcmp.eq.s32.totalorder %v1575_v4, 257 }
 0x17d   : > { %v653_v7 = vsel %vm651_vm1, %v652_v2, %v548_v61  ;;  %v655_v52 = vstv %s1220_s22  ;;  %s1222_s30 = spop %1221  ;;  %vm901_vm1 = vcmp.eq.s32.totalorder %v1575_v4, 258 }
 0x17e   : > { %v656_v53 = vsel %vm654_vm2, %v655_v52, %v653_v7  ;;  %v658_v55 = vstv %s1222_s30  ;;  %s1224_s6 = spop %1223  ;;  %vm904_vm2 = vcmp.eq.s32.totalorder %v1575_v4, 259 }
 0x17f   : > { %v659_v56 = vsel %vm657_vm3, %v658_v55, %v656_v53  ;;  %v661_v49 = vstv %s1224_s6  ;;  %s1226_s7 = spop %1225  ;;  %vm907_vm3 = vcmp.eq.s32.totalorder %v1575_v4, 260 }
 0x180   : > { %v662_v57 = vsel %vm660_vm4, %v661_v49, %v659_v56  ;;  %v664_v58 = vstv %s1226_s7  ;;  %s1228_s8 = spop %1227  ;;  %vm910_vm4 = vcmp.eq.s32.totalorder %v1575_v4, 261 }
 0x181   : > { %v665_v59 = vsel %vm663_vm5, %v664_v58, %v662_v57  ;;  %v667_v60 = vstv %s1228_s8  ;;  %s1230_s9 = spop %1229  ;;  %vm913_vm5 = vcmp.eq.s32.totalorder %v1575_v4, 262 }
 0x182   : > { %v668_v3 = vsel %vm666_vm6, %v667_v60, %v665_v59  ;;  %v670_v46 = vstv %s1230_s9  ;;  %s1232_s10 = spop %1231  ;;  %vm1016_vm6 = vcmp.eq.s32.totalorder %v1575_v4, 640 }
 0x183   : > { %v671_v21 = vsel %vm669_vm7, %v670_v46, %v668_v3  ;;  %v773_v0 = vstv %s1232_s10  ;;  %s1234_s11 = spop %1233  ;;  %vm1019_vm7 = vcmp.eq.s32.totalorder %v1575_v4, 641 }
 0x184   : > { %v774_v23 = vsel %vm772_vm8, %v773_v0, %v671_v21  ;;  %v776_v24 = vstv %s1234_s11  ;;  %s1236_s12 = spop %1235  ;;  %vm1022_vm8 = vcmp.eq.s32.totalorder %v1575_v4, 642 }
 0x185   : > { %v777_v12 = vsel %vm775_vm9, %v776_v24, %v774_v23  ;;  %v779_v8 = vstv %s1236_s12  ;;  %s1238_s18 = spop %1237  ;;  %vm1025_vm9 = vcmp.eq.s32.totalorder %v1575_v4, 643 }
 0x186   : > { %v780_v17 = vsel %vm778_vm10, %v779_v8, %v777_v12  ;;  %v782_v20 = vstv %s1238_s18  ;;  %s1240_s20 = spop %1239  ;;  %vm1028_vm10 = vcmp.eq.s32.totalorder %v1575_v4, 644  ;;  %s290_s18 = scalar_lea.vmem %s1884_s3, %s1172_s24 }
 0x187   : > { %v783_v18 = vsel %vm781_vm11, %v782_v20, %v780_v17  ;;  %v785_v11 = vstv %s1240_s20  ;;  %s1242_s21 = spop %1241  ;;  %vm1031_vm11 = vcmp.eq.s32.totalorder %v1575_v4, 645 }
 0x188   : > { %v786_v22 = vsel %vm784_vm12, %v785_v11, %v783_v18  ;;  %v788_v1 = vstv %s1242_s21  ;;  %s1244_s27 = spop %1243  ;;  %vm1034_vm12 = vcmp.eq.s32.totalorder %v1575_v4, 646 }
 0x189   : > { %v789_v45 = vsel %vm787_vm13, %v788_v1, %v786_v22  ;;  %v791_v27 = vstv %s1244_s27  ;;  %s1246_s28 = spop %1245 }
 0x18a   : > { %v792_v28 = vsel %vm790_vm14, %v791_v27, %v789_v45  ;;  %v896_v16 = vstv %s1246_s28  ;;  %s1248_s29 = spop %1247 }
 0x18b   : > { %v897_v40 = vsel %vm895_vm15, %v896_v16, %v792_v28  ;;  %s1250_s4 = spop %1249  ;;  %v899_v19 = vstv %s1248_s29 }
 0x18c   : > { %v900_v43 = vsel %vm898_vm0, %v899_v19, %v897_v40  ;;  %v902_v30 = vstv %s1250_s4 }
 0x18d   : > { %v903_v54 = vsel %vm901_vm1, %v902_v30, %v900_v43 }
 0x18f   : > { %s1252_s5 = spop %1251 }
 0x190   : > { %v905_v29 = vstv %s1252_s5  ;;  %s1254_s25 = spop %1253 }
 0x191   : > { %v906_v25 = vsel %vm904_vm2, %v905_v29, %v903_v54  ;;  %v908_v10 = vstv %s1254_s25  ;;  %s1256_s26 = spop %1255 }
 0x192   : > { %v909_v14 = vsel %vm907_vm3, %v908_v10, %v906_v25  ;;  %v911_v13 = vstv %s1256_s26 }
 0x193   : > { %v912_v15 = vsel %vm910_vm4, %v911_v13, %v909_v14 }
 0x197   : > { %s1258_s22 = spop %1257 }
 0x198   : > { %v914_v41 = vstv %s1258_s22  ;;  %s1260_s30 = spop %1259 }
 0x199   : > { %v915_v31 = vsel %vm913_vm5, %v914_v41, %v912_v15  ;;  %v1017_v32 = vstv %s1260_s30  ;;  %s1262_s6 = spop %1261 }
 0x19a   : > { %v1018_v26 = vsel %vm1016_vm6, %v1017_v32, %v915_v31  ;;  %v1020_v39 = vstv %s1262_s6 }
 0x19b   : > { %v1021_v33 = vsel %vm1019_vm7, %v1020_v39, %v1018_v26 }
 0x19f   : > { %s1264_s7 = spop %1263 }
 0x1a0   : > { %v1023_v9 = vstv %s1264_s7  ;;  %s1266_s8 = spop %1265 }
 0x1a1   : > { %v1024_v34 = vsel %vm1022_vm8, %v1023_v9, %v1021_v33  ;;  %v1026_v35 = vstv %s1266_s8  ;;  %s1268_s9 = spop %1267 }
 0x1a2   : > { %v1027_v63 = vsel %vm1025_vm9, %v1026_v35, %v1024_v34  ;;  %v1029_v5 = vstv %s1268_s9 }
 0x1a3   : > { %v1030_v62 = vsel %vm1028_vm10, %v1029_v5, %v1027_v63 }
 0x1a7   : > { %s1270_s10 = spop %1269 }
 0x1a8   : > { %v1032_v44 = vstv %s1270_s10  ;;  %s1272_s20 = spop %1271 }
 0x1a9   : > { %v1033_v36 = vsel %vm1031_vm11, %v1032_v44, %v1030_v62  ;;  %v1035_v37 = vstv %s1272_s20 }
 0x1aa   : > { %v1036_v38 = vsel %vm1034_vm12, %v1035_v37, %v1033_v36 }
 0x1ab   : > { %1037 = vst [vmem:[%s290_s18] sm:$0xff] %v1036_v38 }
 0x1ac PF: > { %s19_s17 = sadd.s32 1, %s1456_s17   ;;  %s1887_s12 = smov %s1440_s13 }
 0x1ad   : > { %p16_p0 = scmp.ge.s32.totalorder %s19_s17, 4   ;;  %s1888_s13 = smov %s1444_s14 }
 0x1ae   : > { %s1889_s14 = smov %s1526_s23  ;;  %s1890_s15 = smov %s1452_s16 }
 0x1af   : > { %s1891_s16 = smov %s1893_s19  ;;  %18 = sbr.rel (!%p16_p0) target bundleno = 6 (0x6), region = 92 }
 0x1b4   :  { %1063 = vsyncpa [#allocation3], 1 }
 0x1b5   :  { %1065 = vsyncpa [#allocation3 + $0x1], 1 }
 0x1b6   :  { %1066 = vsyncpa [#allocation5], 1 }
 0x1b7   :  { %1068 = vsyncpa [#allocation5 + $0x1], 1 }

</bundles_post_ra>
